<compile_context>
chip_gen: v7x
topology: tpu7x:2x2x1
jax: 0.10.0
libtpu: 0.0.40
codegen_flags: <defaults>
</compile_context>

<pallas_src>
import functools

import jax
import jax.numpy as jnp
import numpy as np
from jax import lax
from jax.experimental import pallas as pl
from jax.experimental.pallas import tpu as pltpu


def _dropblock_kernel(u_ref, x_ref, o_ref, hsum_ref, *, block_size, gamma):
    """u_ref:    (H+2r, W+2r, TN)  uniform randoms, spatially padded with 1.0
       x_ref:    (H, W, TN)        input activations (native dtype)
       o_ref:    (H, W, TN)        x * block_mask (unscaled)
       hsum_ref: (W, TN) f32       sum of block_mask over H (per-tile partials)
    """
    out_h, out_w = x_ref.shape[0], x_ref.shape[1]

    # Separable (bs x bs) window-min of the uniform field.
    # Vertical pass: static slices along the ref's leading dim (cheap offsets).
    vmin = u_ref[0:out_h, :, :]
    for dy in range(1, block_size):
        vmin = jnp.minimum(vmin, u_ref[dy:dy + out_h, :, :])
    # Horizontal pass: sublane-offset slices of the (smaller) intermediate.
    wmin = vmin[:, 0:out_w, :]
    for dx in range(1, block_size):
        wmin = jnp.minimum(wmin, vmin[:, dx:dx + out_w, :])

    # block_mask: 1.0 where kept, 0.0 inside a dropped block.
    block_mask = (wmin >= gamma).astype(jnp.float32)

    # Unscaled masked output (native dtype; 0/1 mask is exact in bf16 too).
    o_ref[...] = (x_ref[...] * block_mask.astype(x_ref.dtype)).astype(o_ref.dtype)
    # Partial sums for the global rescale (leading-dim reduce = pure VPU adds).
    hsum_ref[...] = jnp.sum(block_mask, axis=0)


def dropblock_forward(x, key, *, drop_prob=0.2, block_size=5, training=True):
    """DropBlock forward pass.  x is NCHW, matching the PyTorch module."""
    if (not training) or drop_prob == 0.0:
        return x

    B, C, H, W = x.shape
    N = B * C
    r = block_size // 2

    # gamma is compile-time static -> baked into the kernel closure.
    gamma = drop_prob / float(block_size ** 2)
    for fs in (H, W):
        gamma *= fs / (fs - block_size + 1)

    # ---- tile the B*C (lane) axis ------------------------------------------
    LANE = 128
    itemsize = jnp.dtype(x.dtype).itemsize
    # per-lane VMEM bytes of one grid step: padded uniforms (f32) + x + out tile
    bytes_per_lane = (H + 2 * r) * (W + 2 * r) * 4 + 2 * H * W * itemsize
    budget = 4 * 1024 * 1024  # ~4 MiB/step; x2 double-buffering stays well
                              # inside the 32 MiB scoped VMEM (sized for v7x).
    tile_n = max(LANE, (budget // bytes_per_lane) // LANE * LANE)
    tile_n = min(tile_n, ((N + LANE - 1) // LANE) * LANE)
    num_tiles = (N + tile_n - 1) // tile_n
    n_pad = num_tiles * tile_n

    # ---- lane-dense operands -------------------------------------------------
    # Uniforms drawn directly in (H, W, N); spatial pad with 1.0 so border
    # cells never fire; lane axis padded up to a tile multiple.
    u = jax.random.uniform(key, (H, W, N), dtype=jnp.float32)
    u_pad = jnp.pad(u, ((r, r), (r, r), (0, n_pad - N)), constant_values=1.0)

    x_l = x.reshape(N, H, W).transpose(1, 2, 0)            # (H, W, N), native dtype
    x_l = jnp.pad(x_l, ((0, 0), (0, 0), (0, n_pad - N)))

    kernel = functools.partial(_dropblock_kernel,
                               block_size=block_size, gamma=float(gamma))

    out_l, hsum = pl.pallas_call(
        kernel,
        out_shape=(
            jax.ShapeDtypeStruct((H, W, n_pad), x.dtype),
            jax.ShapeDtypeStruct((W, n_pad), jnp.float32),
        ),
        grid=(num_tiles,),
        in_specs=[
            pl.BlockSpec((H + 2 * r, W + 2 * r, tile_n), lambda i: (0, 0, i)),
            pl.BlockSpec((H, W, tile_n), lambda i: (0, 0, i)),
        ],
        out_specs=(
            pl.BlockSpec((H, W, tile_n), lambda i: (0, 0, i)),
            pl.BlockSpec((W, tile_n), lambda i: (0, i)),
        ),
        compiler_params=pltpu.CompilerParams(
            dimension_semantics=("parallel",),   # v7x: shard N-tiles across 2 TCs
            vmem_limit_bytes=32 * 1024 * 1024,
        ),
    )(u_pad, x_l)

    # ---- global rescale: sum must cover the whole (B,C,H,W) mask ------------
    total = jnp.sum(hsum[:, :N])                    # exclude padded lanes
    scale = jnp.float32(N * H * W) / jnp.maximum(total, 1.0)  # guard total==0

    out = (out_l[:, :, :N].astype(jnp.float32) * scale).astype(x.dtype)
    return out.transpose(2, 0, 1).reshape(B, C, H, W)


def _reference(x, key, *, drop_prob=0.2, block_size=5):
    """Pure-JAX reference replicating the PyTorch semantics (same randoms)."""
    B, C, H, W = x.shape
    r = block_size // 2
    gamma = drop_prob / float(block_size ** 2)
    for fs in (H, W):
        gamma *= fs / (fs - block_size + 1)
    # Same uniform field as the kernel wrapper (drawn in (H, W, N) layout).
    u = jax.random.uniform(key, (H, W, B * C), dtype=jnp.float32)
    u = u.transpose(2, 0, 1).reshape(B, C, H, W)
    mask = (u < gamma).astype(jnp.float32)
    pooled = lax.reduce_window(
        mask, -jnp.inf, lax.max,
        window_dimensions=(1, 1, block_size, block_size),
        window_strides=(1, 1, 1, 1),
        padding=((0, 0), (0, 0), (r, r), (r, r)),
    )
    if block_size % 2 == 0:
        pooled = pooled[:, :, :-1, :-1]
    block_mask = 1.0 - pooled
    total = jnp.sum(block_mask)
    scale = block_mask.size / jnp.maximum(total, 1.0)
    return x * block_mask * scale


if __name__ == "__main__":
    key = jax.random.PRNGKey(0)
    k_x, k_mask = jax.random.split(key)

    B, C, H, W = 2, 4, 16, 16
    x = jax.random.normal(k_x, (B, C, H, W), dtype=jnp.float32)

    out = dropblock_forward(x, k_mask, drop_prob=0.2, block_size=5, training=True)
    out = jax.block_until_ready(out)

    ref = jax.block_until_ready(_reference(x, k_mask, drop_prob=0.2, block_size=5))
    np.testing.assert_allclose(np.asarray(out), np.asarray(ref), rtol=1e-5, atol=1e-6)

    # eval / drop_prob=0 path is identity
    same = dropblock_forward(x, k_mask, drop_prob=0.2, block_size=5, training=False)
    np.testing.assert_allclose(np.asarray(same), np.asarray(x))

    print("KERNEL_OK")
</pallas_src>

<mosaic_0001>
module attributes {stable_mosaic.version = 11 : i64} {
  func.func @_dropblock_kernel(%arg0: i32, %arg1: memref<20x20x128xf32, #tpu.memory_space<vmem>>, %arg2: memref<16x16x128xf32, #tpu.memory_space<vmem>>, %arg3: memref<16x16x128xf32, #tpu.memory_space<vmem>>, %arg4: memref<16x128xf32, #tpu.memory_space<vmem>>) attributes {dimension_semantics = [#tpu.dimension_semantics<parallel>], iteration_bounds = array<i64: 1>, scalar_prefetch = 0 : i64, scratch_operands = 0 : i64, tpu.core_type = #tpu.core_type<tc>, window_params = [{transform_indices = @transform_0, window_bounds = array<i64: 20, 20, 128>}, {transform_indices = @transform_1, window_bounds = array<i64: 16, 16, 128>}, {transform_indices = @transform_2, window_bounds = array<i64: 16, 16, 128>}, {transform_indices = @transform_3, window_bounds = array<i64: 16, 128>}]} {
    %c0 = arith.constant 0 : index
    %c0_0 = arith.constant 0 : index
    %c0_1 = arith.constant 0 : index
    %0 = vector.load %arg1[%c0, %c0_0, %c0_1] : memref<20x20x128xf32, #tpu.memory_space<vmem>>, vector<16x20x128xf32>
    %c1 = arith.constant 1 : index
    %c0_2 = arith.constant 0 : index
    %c0_3 = arith.constant 0 : index
    %1 = vector.load %arg1[%c1, %c0_2, %c0_3] : memref<20x20x128xf32, #tpu.memory_space<vmem>>, vector<16x20x128xf32>
    %2 = arith.minimumf %0, %1 : vector<16x20x128xf32>
    %c2 = arith.constant 2 : index
    %c0_4 = arith.constant 0 : index
    %c0_5 = arith.constant 0 : index
    %3 = vector.load %arg1[%c2, %c0_4, %c0_5] : memref<20x20x128xf32, #tpu.memory_space<vmem>>, vector<16x20x128xf32>
    %4 = arith.minimumf %2, %3 : vector<16x20x128xf32>
    %c3 = arith.constant 3 : index
    %c0_6 = arith.constant 0 : index
    %c0_7 = arith.constant 0 : index
    %5 = vector.load %arg1[%c3, %c0_6, %c0_7] : memref<20x20x128xf32, #tpu.memory_space<vmem>>, vector<16x20x128xf32>
    %6 = arith.minimumf %4, %5 : vector<16x20x128xf32>
    %c4 = arith.constant 4 : index
    %c0_8 = arith.constant 0 : index
    %c0_9 = arith.constant 0 : index
    %7 = vector.load %arg1[%c4, %c0_8, %c0_9] : memref<20x20x128xf32, #tpu.memory_space<vmem>>, vector<16x20x128xf32>
    %8 = arith.minimumf %6, %7 : vector<16x20x128xf32>
    %9 = vector.extract_strided_slice %8 {offsets = [0, 0, 0], sizes = [16, 16, 128], strides = [1, 1, 1]} : vector<16x20x128xf32> to vector<16x16x128xf32>
    %10 = vector.extract_strided_slice %8 {offsets = [0, 1, 0], sizes = [16, 16, 128], strides = [1, 1, 1]} : vector<16x20x128xf32> to vector<16x16x128xf32>
    %11 = arith.minimumf %9, %10 : vector<16x16x128xf32>
    %12 = vector.extract_strided_slice %8 {offsets = [0, 2, 0], sizes = [16, 16, 128], strides = [1, 1, 1]} : vector<16x20x128xf32> to vector<16x16x128xf32>
    %13 = arith.minimumf %11, %12 : vector<16x16x128xf32>
    %14 = vector.extract_strided_slice %8 {offsets = [0, 3, 0], sizes = [16, 16, 128], strides = [1, 1, 1]} : vector<16x20x128xf32> to vector<16x16x128xf32>
    %15 = arith.minimumf %13, %14 : vector<16x16x128xf32>
    %16 = vector.extract_strided_slice %8 {offsets = [0, 4, 0], sizes = [16, 16, 128], strides = [1, 1, 1]} : vector<16x20x128xf32> to vector<16x16x128xf32>
    %17 = arith.minimumf %15, %16 : vector<16x16x128xf32>
    %cst = arith.constant 0.0142222224 : f32
    %18 = vector.broadcast %cst : f32 to vector<16x16x128xf32>
    %19 = arith.cmpf oge, %17, %18 : vector<16x16x128xf32>
    %20 = arith.extui %19 : vector<16x16x128xi1> to vector<16x16x128xi32>
    %21 = arith.sitofp %20 : vector<16x16x128xi32> to vector<16x16x128xf32>
    %c0_10 = arith.constant 0 : index
    %c0_11 = arith.constant 0 : index
    %c0_12 = arith.constant 0 : index
    %22 = vector.load %arg2[%c0_10, %c0_11, %c0_12] : memref<16x16x128xf32, #tpu.memory_space<vmem>>, vector<16x16x128xf32>
    %23 = arith.mulf %22, %21 : vector<16x16x128xf32>
    %c0_13 = arith.constant 0 : index
    %c0_14 = arith.constant 0 : index
    %c0_15 = arith.constant 0 : index
    %24 = vector.load %arg3[%c0_13, %c0_14, %c0_15] : memref<16x16x128xf32, #tpu.memory_space<vmem>>, vector<16x16x128xf32>
    tpu.vector_store %arg3[%c0_13, %c0_14, %c0_15], %23 {strides = array<i32>} : memref<16x16x128xf32, #tpu.memory_space<vmem>>, vector<16x16x128xf32>,
    %cst_16 = arith.constant dense<0.000000e+00> : vector<16x128xf32>
    %25 = vector.multi_reduction <add>, %21, %cst_16 [0] : vector<16x16x128xf32> to vector<16x128xf32>
    %c0_17 = arith.constant 0 : index
    %c0_18 = arith.constant 0 : index
    %26 = vector.load %arg4[%c0_17, %c0_18] : memref<16x128xf32, #tpu.memory_space<vmem>>, vector<16x128xf32>
    tpu.vector_store %arg4[%c0_17, %c0_18], %25 {strides = array<i32>} : memref<16x128xf32, #tpu.memory_space<vmem>>, vector<16x128xf32>,
    return
  }
  func.func @transform_0(%arg0: i32) -> (i32, i32, i32) {
    %c0_i32 = arith.constant 0 : i32
    %c0_i32_0 = arith.constant 0 : i32
    %c0_i32_1 = arith.constant 0 : i32
    return %c0_i32, %c0_i32_0, %arg0 : i32, i32, i32
  }
  func.func @transform_1(%arg0: i32) -> (i32, i32, i32) {
    %c0_i32 = arith.constant 0 : i32
    %c0_i32_0 = arith.constant 0 : i32
    %c0_i32_1 = arith.constant 0 : i32
    return %c0_i32, %c0_i32_0, %arg0 : i32, i32, i32
  }
  func.func @transform_2(%arg0: i32) -> (i32, i32, i32) {
    %c0_i32 = arith.constant 0 : i32
    %c0_i32_0 = arith.constant 0 : i32
    %c0_i32_1 = arith.constant 0 : i32
    return %c0_i32, %c0_i32_0, %arg0 : i32, i32, i32
  }
  func.func @transform_3(%arg0: i32) -> (i32, i32) {
    %c0_i32 = arith.constant 0 : i32
    %c0_i32_0 = arith.constant 0 : i32
    return %c0_i32, %arg0 : i32, i32
  }
}

</mosaic_0001>

<bundles_post_ra>
// kernel: tpu_custom_call.1
= control target key start
LH: loop header
LB: loop body
LE: loop exit
PB: predicated region body
PF: predicated region fallthrough
CT: control target
= control target key end

     0   :  { %9 = vsyncpa [#allocation3], 0  ;;  %s2157_s0 = inlined_call_operand.hbm [shape: f32[20,20,128], index: 0, kind: input, shape index: {}]   ;;  %s2158_s1 = inlined_call_operand.hbm [shape: f32[16,16,128], index: 1, kind: input, shape index: {}]   ;;  %s2159_s2 = inlined_call_operand.hbm [shape: f32[16,16,128], index: 2, kind: output, shape index: {0}]   ;;  %s2160_s3 = inlined_call_operand.hbm [shape: f32[16,128], index: 3, kind: output, shape index: {1}]  }
   0x1   :  { %10 = vsyncpa [#allocation6], 0 }
   0x2   :  { %11 = vsyncpa [#allocation4], 0 }
   0x3   :  { %12 = vsyncpa [#allocation9], 0  ;;  %s1500_s12 = smov [#allocation2]   ;;  %s1404_s16 = scalar_lea.hbm %s2157_s0, 7680 }
   0x4   :  { %s18_s13 = sshll.u32 %s1500_s12, 4  ;;  %p1405_p0 = scmp.ne.s32.totalorder %s2157_s0, %s1404_s16  ;;  %s19_s13 = int_to_ptr.vmem [resolvable:$true] %s18_s13 }
   0x5   :  { %p1408_p1 = scmp.lt.u32.totalorder %s1404_s16, %s2157_s0 }
   0x7   :  { %p1410_p2 = pnand %p1408_p1, %p1405_p0 }
   0x9   :  { %1413 = shalt.err (!%p1410_p2)
}
   0xa   :  { %s1414_s21 = scalar_lea.vmem %s19_s13, 7680  ;;  %p1419_p4 = scmp.lt.s32.totalorder %s19_s13, %s19_s13 }
   0xb   :  { %p1415_p3 = scmp.ne.s32.totalorder %s19_s13, %s1414_s21  ;;  %p1420_p5 = scmp.lt.s32.totalorder %s1414_s21, %s1414_s21 }
   0xd   :  { %p1421_p6 = por %p1420_p5, %p1419_p4 }
   0xf   :  { %p1422_p7 = pnand %p1421_p6, %p1415_p3 }
  0x11   :  { %1425 = shalt.err (!%p1422_p7)
}
  0x12   :  { %s1501_s22 = smov 128   ;;  %s1502_s23 = smov 8  }
  0x13   :  { %24 = dma.hbm_to_vmem [thread:$0]  %s2157_s0, 7680, %s19_s13, [#allocation3], %s1501_s22, %s1501_s22, %s1502_s23  }
  0x14   :  { %s1503_s26 = smov [#allocation5]   ;;  %s1426_s30 = scalar_lea.hbm %s2158_s1, 4096 }
  0x15   :  { %s30_s27 = sshll.u32 %s1503_s26, 4  ;;  %p1427_p8 = scmp.ne.s32.totalorder %s2158_s1, %s1426_s30  ;;  %s31_s27 = int_to_ptr.vmem [resolvable:$true] %s30_s27 }
  0x16   :  { %p1430_p9 = scmp.lt.u32.totalorder %s1426_s30, %s2158_s1 }
  0x18   :  { %p1432_p10 = pnand %p1430_p9, %p1427_p8 }
  0x1a   :  { %1435 = shalt.err (!%p1432_p10)
}
  0x1b   :  { %s1436_s8 = scalar_lea.vmem %s31_s27, 4096  ;;  %p1441_p12 = scmp.lt.s32.totalorder %s31_s27, %s31_s27 }
  0x1c   :  { %p1437_p11 = scmp.ne.s32.totalorder %s31_s27, %s1436_s8  ;;  %p1442_p13 = scmp.lt.s32.totalorder %s1436_s8, %s1436_s8 }
  0x1e   :  { %p1443_p0 = por %p1442_p13, %p1441_p12 }
  0x20   :  { %p1444_p1 = pnand %p1443_p0, %p1437_p11 }
  0x22   :  { %1447 = shalt.err (!%p1444_p1)
}
  0x23   :  { %36 = dma.hbm_to_vmem [thread:$0]  %s2158_s1, 4096, %s31_s27, [#allocation6], %s1501_s22, %s1501_s22, %s1502_s23  }
  0x24   :  { %1492 = dma.done.wait [#allocation3], 7680  }
  0x25   :  { %1493 = vsyncadd [#allocation3], 4294959616 }
  0x26   :  { %1494 = dma.done.wait [#allocation6], 4096  }
  0x27   :  { %1495 = vsyncadd [#allocation6], 4294963200  ;;  %v43_v0 = vld [vmem:[#allocation2] sm:$0xff]  ;;  %v44_v1 = vld [vmem:[#allocation2 + $0x8] sm:$0xff]  ;;  %vm527_vm0 = vcmask 1046528   ;;  %vm672_vm1 = vcmask 1045504  }
  0x28   :  { %v92_v2 = vld [vmem:[#allocation2 + $0x18] sm:$0xff]  ;;  %v93_v3 = vld [vmem:[#allocation2 + $0x20] sm:$0xff]  ;;  %v189_v5 = vld [vmem:[#allocation2 + $0x30] sm:$0xff]  ;;  %vm817_vm2 = vcmask 1044480   ;;  %vm962_vm3 = vcmask 1043456   ;;  %s1505_s1 = smov [#allocation7]  }
  0x29   :  { %v140_v4 = vmin.f32 %v43_v0, %v92_v2  ;;  %v190_v6 = vld [vmem:[#allocation2 + $0x38] sm:$0xff]  ;;  %v141_v7 = vmin.f32 %v44_v1, %v93_v3  ;;  %v286_v8 = vld [vmem:[#allocation2 + $0x48] sm:$0xff]  ;;  %v1557_v9 = vld [vmem:[#allocation2 + $0x50] sm:$0xff]  ;;  %v143_v11 = vmin.f32 %v92_v2, %v189_v5  ;;  %s1336_s10 = sshll.u32 %s1505_s1, 4  ;;  %s1506_s11 = smov [#allocation8]   ;;  %s1337_s10 = int_to_ptr.vmem [resolvable:$true] %s1336_s10 }
  0x2a   :  { %v1559_v10 = vld [vmem:[#allocation2 + $0x60] sm:$0xff]  ;;  %v144_v12 = vmin.f32 %v93_v3, %v190_v6  ;;  %v1561_v14 = vld [vmem:[#allocation2 + $0x68] sm:$0xff]  ;;  %v45_v15 = vld [vmem:[#allocation2 + $0x10] sm:$0xf]  ;;  %v146_v16 = vmin.f32 %v189_v5, %v286_v8  ;;  %v147_v17 = vmin.f32 %v190_v6, %v1557_v9  ;;  %s1348_s12 = sshll.u32 %s1506_s11, 4  ;;  %s1448_s13 = scalar_lea.vmem %s1337_s10, 4096  ;;  %s2120_s12 = int_to_ptr.vmem [resolvable:$true] %s1348_s12 }
  0x2b   :  { %v237_v13 = vmin.f32 %v140_v4, %v189_v5  ;;  %v149_v18 = vmin.f32 %v286_v8, %v1559_v10  ;;  %v238_v19 = vmin.f32 %v141_v7, %v190_v6  ;;  %v94_v20 = vld [vmem:[#allocation2 + $0x28] sm:$0xf]  ;;  %v191_v21 = vld [vmem:[#allocation2 + $0x40] sm:$0xf]  ;;  %v240_v22 = vmin.f32 %v143_v11, %v286_v8  ;;  %v1568_v27 = vld [vmem:[#allocation2 + $0x78] sm:$0xff]  ;;  %p1449_p2 = scmp.ne.s32.totalorder %s1337_s10, %s1448_s13  ;;  %p1453_p3 = scmp.lt.s32.totalorder %s1337_s10, %s1337_s10 }
  0x2c   :  { %v241_v23 = vmin.f32 %v144_v12, %v1557_v9  ;;  %v150_v24 = vmin.f32 %v1557_v9, %v1561_v14  ;;  %v142_v26 = vmin.f32 %v45_v15, %v94_v20  ;;  %v1571_v28 = vmin.f32 %v146_v16, %v1559_v10  ;;  %v1579_v33 = vld [vmem:[#allocation2 + $0x80] sm:$0xff]  ;;  %v48_v34 = vld [vmem:[#allocation2 + $0x28] sm:$0xf]  ;;  %v288_v42 = vld [vmem:[#allocation2 + $0x58] sm:$0xf]  ;;  %p1454_p4 = scmp.lt.s32.totalorder %s1448_s13, %s1448_s13 }
  0x2d   :  { %v334_v25 = vmin.f32 %v237_v13, %v286_v8  ;;  %v1574_v29 = vmin.f32 %v147_v17, %v1561_v14  ;;  %v335_v30 = vmin.f32 %v238_v19, %v1557_v9  ;;  %v337_v31 = vmin.f32 %v240_v22, %v1559_v10  ;;  %v97_v38 = vld [vmem:[#allocation2 + $0x40] sm:$0xf]  ;;  %v385_v54 = vld [vmem:[#allocation2 + $0x70] sm:$0xf]  ;;  %v1613_v20 = vld [vmem:[#allocation2 + $0x98] sm:$0xff] }
  0x2e   :  { %v338_v32 = vmin.f32 %v241_v23, %v1561_v14  ;;  %v1582_v35 = vmin.f32 %v149_v18, %v1568_v27  ;;  %v239_v37 = vmin.f32 %v142_v26, %v191_v21  ;;  %v340_v39 = vmin.f32 %v1571_v28, %v1568_v27  ;;  %v194_v18 = vld [vmem:[#allocation2 + $0x58] sm:$0xf]  ;;  %v1611_v19 = vld [vmem:[#allocation2 + $0x90] sm:$0xff]  ;;  %v1618_v26 = vld [vmem:[#allocation2 + $0x40] sm:$0xf]  ;;  %p1455_p5 = por %p1454_p4, %p1453_p3 }
  0x2f   :  { %v431_v36 = vmin.f32 %v334_v25, %v1559_v10  ;;  %v341_v40 = vmin.f32 %v1574_v29, %v1579_v33  ;;  %v432_v41 = vmin.f32 %v335_v30, %v1561_v14  ;;  %v434_v43 = vmin.f32 %v337_v31, %v1568_v27  ;;  %v1620_v28 = vld [vmem:[#allocation2 + $0x58] sm:$0xf] }
  0x30   :  { %v1592_v44 = vmin.f32 %v338_v32, %v1579_v33  ;;  %v145_v45 = vmin.f32 %v48_v34, %v97_v38  ;;  %v336_v55 = vmin.f32 %v239_v37, %v288_v42  ;;  %v291_v34 = vld [vmem:[#allocation2 + $0x70] sm:$0xf]  ;;  %v1625_v38 = vmin.f32 %v340_v39, %v1611_v19  ;;  %p1456_p6 = pnand %p1455_p5, %p1449_p2 }
  0x31   :  { %v528_v46 = vrot.slane %v431_v36, 1  ;;  %v673_v47 = vrot.slane %v431_v36, 2  ;;  %v818_v48 = vrot.slane %v431_v36, 3  ;;  %v963_v49 = vrot.slane %v431_v36, 4 }
  0x32   :  { %v529_v50 = vrot.slane %v432_v41, 1  ;;  %v674_v51 = vrot.slane %v432_v41, 2  ;;  %v819_v52 = vrot.slane %v432_v41, 3  ;;  %v964_v53 = vrot.slane %v432_v41, 4 }
  0x33   :  { %v533_v56 = vrot.slane %v434_v43, 1  ;;  %v534_v57 = vrot.slane %v1592_v44, 1  ;;  %v678_v58 = vrot.slane %v434_v43, 2  ;;  %v433_v0 = vmin.f32 %v336_v55, %v385_v54 }
  0x34   :  { %v530_v59 = vsel %vm527_vm0, %v528_v46, %v529_v50  ;;  %v675_v60 = vsel %vm672_vm1, %v673_v47, %v674_v51  ;;  %v820_v61 = vsel %vm817_vm2, %v818_v48, %v819_v52  ;;  %v965_v62 = vsel %vm962_vm3, %v963_v49, %v964_v53  ;;  %v388_v48 = vld [vmem:[#allocation2 + $0x88] sm:$0xf] }
  0x35   :  { %v640_v63 = vmin.f32 %v431_v36, %v530_v59  ;;  %v535_v1 = vsel %vm527_vm0, %v533_v56, %v534_v57  ;;  %v679_v2 = vrot.slane %v1592_v44, 2  ;;  %v823_v4 = vrot.slane %v434_v43, 3  ;;  %v1205_v56 = vld [vmem:[#allocation5 + $0x10] sm:$0xff] }
  0x36   :  { %v642_v3 = vmin.f32 %v434_v43, %v535_v1  ;;  %v824_v5 = vrot.slane %v1592_v44, 3  ;;  %v968_v6 = vrot.slane %v434_v43, 4  ;;  %v531_v8 = vrot.slane %v433_v0, 1  ;;  %v1203_v43 = vld [vmem:[#allocation5] sm:$0xff] }
  0x37   :  { %v785_v7 = vmin.f32 %v640_v63, %v675_v60  ;;  %v676_v11 = vrot.slane %v433_v0, 2  ;;  %v821_v12 = vrot.slane %v433_v0, 3  ;;  %v966_v13 = vrot.slane %v433_v0, 4 }
  0x38   :  { %v680_v15 = vsel %vm672_vm1, %v678_v58, %v679_v2  ;;  %v825_v16 = vsel %vm817_vm2, %v823_v4, %v824_v5  ;;  %v969_v17 = vrot.slane %v1592_v44, 4  ;;  %v532_v22 = vsel %vm527_vm0, %v529_v50, %v531_v8 }
  0x39   :  { %v930_v21 = vmin.f32 %v785_v7, %v820_v61  ;;  %v677_v23 = vsel %vm672_vm1, %v674_v51, %v676_v11  ;;  %v822_v25 = vsel %vm817_vm2, %v819_v52, %v821_v12  ;;  %v641_v29 = vmin.f32 %v432_v41, %v532_v22 }
  0x3a   :  { %v967_v30 = vsel %vm962_vm3, %v964_v53, %v966_v13  ;;  %v787_v31 = vmin.f32 %v642_v3, %v680_v15  ;;  %v970_v32 = vsel %vm962_vm3, %v968_v6, %v969_v17  ;;  %v242_v37 = vmin.f32 %v145_v45, %v194_v18  ;;  %v197_v15 = vld [vmem:[#allocation2 + $0x70] sm:$0xf] }
  0x3b   :  { %v1075_v36 = vmin.f32 %v930_v21, %v965_v62  ;;  %v1628_v42 = vmin.f32 %v341_v40, %v1613_v20  ;;  %v786_v46 = vmin.f32 %v641_v29, %v677_v23  ;;  %v148_v41 = vmin.f32 %v1618_v26, %v1620_v28  ;;  %v1204_v62 = vld [vmem:[#allocation5 + $0x8] sm:$0xff]  ;;  %v103_v23 = vld [vmem:[#allocation2 + $0x70] sm:$0xf] }
  0x3c   :  { %v932_v47 = vmin.f32 %v787_v31, %v825_v16  ;;  %v1636_v49 = vmin.f32 %v150_v24, %v1579_v33  ;;  %v339_v45 = vmin.f32 %v242_v37, %v291_v34  ;;  %v538_v39 = vrot.slane %v1625_v38, 1  ;;  %v294_v28 = vld [vmem:[#allocation2 + $0x88] sm:$0xf] }
  0x3d   :  { %vm1107_vm4 = vcmp.ge.f32.partialorder %v1075_v36, 0.014222222  ;;  %v539_v40 = vrot.slane %v1628_v42, 1  ;;  %v1504_v50 = vmov 0.0   ;;  %v931_v52 = vmin.f32 %v786_v46, %v822_v25  ;;  %v1667_v29 = vld [vmem:[#allocation2 + $0xa8] sm:$0xff] }
  0x3e   :  { %v1365_v51 = vsel %vm1107_vm4, 1.0, %v1504_v50  ;;  %v1077_v53 = vmin.f32 %v932_v47, %v970_v32  ;;  %v683_v54 = vrot.slane %v1625_v38, 2  ;;  %v436_v58 = vmin.f32 %v339_v45, %v388_v48  ;;  %v1673_v32 = vld [vmem:[#allocation2 + $0xb0] sm:$0xff]  ;;  %v200_v34 = vld [vmem:[#allocation2 + $0x88] sm:$0xf] }
  0x3f   :  { %v1235_v55 = vmul.f32 %v1365_v51, %v1203_v43  ;;  %v540_v9 = vsel %vm527_vm0, %v538_v39, %v539_v40  ;;  %v684_v24 = vrot.slane %v1628_v42, 2  ;;  %v1076_v59 = vmin.f32 %v931_v52, %v967_v30 }
  0x40   :  { %vm1109_vm5 = vcmp.ge.f32.partialorder %v1077_v53, 0.014222222  ;;  %v644_v60 = vmin.f32 %v1625_v38, %v540_v9  ;;  %v828_v61 = vrot.slane %v1625_v38, 3  ;;  %v536_v0 = vrot.slane %v436_v58, 1 }
  0x41   :  { %1267 = vst [vmem:[#allocation7] sm:$0xff] %v1235_v55  ;;  %v1367_v63 = vsel %vm1109_vm5, 1.0, %v1504_v50  ;;  %v681_v1 = vrot.slane %v436_v58, 2  ;;  %v826_v3 = vrot.slane %v436_v58, 3  ;;  %vm1108_vm6 = vcmp.ge.f32.partialorder %v1076_v59, 0.014222222 }
  0x42   :  { %v1237_v4 = vmul.f32 %v1367_v63, %v1205_v56  ;;  %v1299_v6 = vadd.f32 %v1367_v63, %v1365_v51  ;;  %v971_v7 = vrot.slane %v436_v58, 4  ;;  %v1366_v8 = vsel %vm1108_vm6, 1.0, %v1504_v50  ;;  %v1206_v56 = vld [vmem:[#allocation5 + $0x18] sm:$0xff] }
  0x43   :  { %v537_v11 = vsel %vm527_vm0, %v534_v57, %v536_v0  ;;  %v682_v12 = vsel %vm672_vm1, %v679_v2, %v681_v1  ;;  %v827_v13 = vsel %vm817_vm2, %v824_v5, %v826_v3  ;;  %v1236_v16 = vmul.f32 %v1366_v8, %v1204_v62  ;;  %v54_v57 = vld [vmem:[#allocation2 + $0x58] sm:$0xf] }
  0x44   :  { %1269 = vst [vmem:[#allocation7 + $0x10] sm:$0xff] %v1237_v4  ;;  %v643_v18 = vmin.f32 %v1592_v44, %v537_v11  ;;  %v972_v21 = vsel %vm962_vm3, %v969_v17, %v971_v7  ;;  %v685_v22 = vsel %vm672_vm1, %v683_v54, %v684_v24  ;;  %v829_v2 = vrot.slane %v1628_v42, 3 }
  0x45   :  { %v789_v25 = vmin.f32 %v644_v60, %v685_v22  ;;  %v973_v26 = vrot.slane %v1625_v38, 4  ;;  %v974_v5 = vrot.slane %v1628_v42, 4  ;;  %1268 = vst [vmem:[#allocation7 + $0x8] sm:$0xff] %v1236_v16  ;;  %v245_v30 = vmin.f32 %v148_v41, %v197_v15  ;;  %v391_v38 = vld [vmem:[#allocation2 + $0xa0] sm:$0xf] }
  0x46   :  { %v788_v44 = vmin.f32 %v643_v18, %v682_v12  ;;  %v343_v17 = vmin.f32 %v1582_v35, %v1611_v19  ;;  %v344_v31 = vmin.f32 %v1636_v49, %v1613_v20  ;;  %v830_v36 = vsel %vm817_vm2, %v828_v61, %v829_v2  ;;  %v297_v12 = vld [vmem:[#allocation2 + $0xa0] sm:$0xf] }
  0x47   :  { %v975_v37 = vsel %vm962_vm3, %v973_v26, %v974_v5  ;;  %v151_v43 = vmin.f32 %v54_v57, %v103_v23  ;;  %v152_v46 = vmin.f32 %v1559_v10, %v1568_v27  ;;  %v934_v48 = vmin.f32 %v789_v25, %v830_v36  ;;  %v1207_v10 = vld [vmem:[#allocation5 + $0x20] sm:$0xff]  ;;  %v106_v23 = vld [vmem:[#allocation2 + $0x88] sm:$0xf] }
  0x48   :  { %v933_v47 = vmin.f32 %v788_v44, %v827_v13  ;;  %v342_v41 = vmin.f32 %v245_v30, %v294_v28  ;;  %v440_v35 = vmin.f32 %v343_v17, %v1667_v29  ;;  %v1681_v45 = vmin.f32 %v344_v31, %v1673_v32  ;;  %v1711_v36 = vld [vmem:[#allocation2 + $0xc8] sm:$0xff] }
  0x49   :  { %v248_v49 = vmin.f32 %v151_v43, %v200_v34  ;;  %v153_v39 = vmin.f32 %v1561_v14, %v1579_v33  ;;  %v249_v51 = vmin.f32 %v152_v46, %v1611_v19  ;;  %v1079_v53 = vmin.f32 %v934_v48, %v975_v37 }
  0x4a   :  { %v1078_v52 = vmin.f32 %v933_v47, %v972_v21  ;;  %v439_v54 = vmin.f32 %v342_v41, %v391_v38  ;;  %v543_v55 = vrot.slane %v440_v35, 1  ;;  %v544_v58 = vrot.slane %v1681_v45, 1  ;;  %v394_v21 = vld [vmem:[#allocation2 + $0xb8] sm:$0xf] }
  0x4b   :  { %v688_v9 = vrot.slane %v440_v35, 2  ;;  %v689_v59 = vrot.slane %v1681_v45, 2  ;;  %v833_v60 = vrot.slane %v440_v35, 3  ;;  %vm1111_vm8 = vcmp.ge.f32.partialorder %v1079_v53, 0.014222222 }
  0x4c   :  { %vm1110_vm7 = vcmp.ge.f32.partialorder %v1078_v52, 0.014222222  ;;  %v541_v61 = vrot.slane %v439_v54, 1  ;;  %v686_v62 = vrot.slane %v439_v54, 2  ;;  %v1369_v63 = vsel %vm1111_vm8, 1.0, %v1504_v50 }
  0x4d   :  { %v1368_v14 = vsel %vm1110_vm7, 1.0, %v1504_v50  ;;  %v831_v0 = vrot.slane %v439_v54, 3  ;;  %v976_v1 = vrot.slane %v439_v54, 4  ;;  %v1239_v7 = vmul.f32 %v1369_v63, %v1207_v10  ;;  %v1208_v54 = vld [vmem:[#allocation5 + $0x28] sm:$0xff] }
  0x4e   :  { %v1238_v3 = vmul.f32 %v1368_v14, %v1206_v56  ;;  %v1314_v4 = vadd.f32 %v1368_v14, %v1366_v8  ;;  %v1300_v11 = vadd.f32 %v1369_v63, %v1299_v6  ;;  %v542_v13 = vsel %vm527_vm0, %v539_v40, %v541_v61  ;;  %v1702_v40 = vld [vmem:[#allocation2 + $0x70] sm:$0xf] }
  0x4f   :  { %v687_v15 = vsel %vm672_vm1, %v684_v24, %v686_v62  ;;  %v832_v16 = vsel %vm817_vm2, %v829_v2, %v831_v0  ;;  %v977_v18 = vsel %vm962_vm3, %v974_v5, %v976_v1  ;;  %1271 = vst [vmem:[#allocation7 + $0x20] sm:$0xff] %v1239_v7  ;;  %v645_v8 = vmin.f32 %v1628_v42, %v542_v13  ;;  %v1705_v5 = vld [vmem:[#allocation2 + $0xc0] sm:$0xff] }
  0x50   :  { %1270 = vst [vmem:[#allocation7 + $0x18] sm:$0xff] %v1238_v3  ;;  %v545_v6 = vsel %vm527_vm0, %v543_v55, %v544_v58  ;;  %v690_v22 = vsel %vm672_vm1, %v688_v9, %v689_v59  ;;  %v834_v57 = vrot.slane %v1681_v45, 3  ;;  %v978_v24 = vrot.slane %v440_v35, 4  ;;  %v203_v7 = vld [vmem:[#allocation2 + $0xa0] sm:$0xf] }
  0x51   :  { %v646_v25 = vmin.f32 %v440_v35, %v545_v6  ;;  %v979_v2 = vrot.slane %v1681_v45, 4  ;;  %v345_v26 = vmin.f32 %v248_v49, %v297_v12  ;;  %v790_v28 = vmin.f32 %v645_v8, %v687_v15 }
  0x52   :  { %v835_v44 = vsel %vm817_vm2, %v833_v60, %v834_v57  ;;  %v250_v42 = vmin.f32 %v153_v39, %v1613_v20  ;;  %v346_v30 = vmin.f32 %v249_v51, %v1667_v29  ;;  %v154_v37 = vmin.f32 %v1702_v40, %v106_v23 }
  0x53   :  { %v791_v17 = vmin.f32 %v646_v25, %v690_v22  ;;  %v980_v31 = vsel %vm962_vm3, %v978_v24, %v979_v2  ;;  %v442_v34 = vmin.f32 %v345_v26, %v394_v21  ;;  %v935_v38 = vmin.f32 %v790_v28, %v832_v16  ;;  %v300_v16 = vld [vmem:[#allocation2 + $0xb8] sm:$0xf]  ;;  %v109_v22 = vld [vmem:[#allocation2 + $0xa0] sm:$0xf]  ;;  %v397_v26 = vld [vmem:[#allocation2 + $0xd0] sm:$0xf] }
  0x54   :  { %v347_v43 = vmin.f32 %v250_v42, %v1673_v32  ;;  %v443_v46 = vmin.f32 %v346_v30, %v1705_v5  ;;  %v155_v47 = vmin.f32 %v1568_v27, %v1611_v19  ;;  %v1209_v27 = vld [vmem:[#allocation5 + $0x30] sm:$0xff]  ;;  %v156_v23 = vmin.f32 %v1579_v33, %v1613_v20  ;;  %v1210_v42 = vld [vmem:[#allocation5 + $0x38] sm:$0xff] }
  0x55   :  { %v936_v48 = vmin.f32 %v791_v17, %v835_v44  ;;  %v546_v41 = vrot.slane %v442_v34, 1  ;;  %v691_v35 = vrot.slane %v442_v34, 2  ;;  %v836_v49 = vrot.slane %v442_v34, 3  ;;  %v206_v44 = vld [vmem:[#allocation2 + $0xb8] sm:$0xf] }
  0x56   :  { %v1080_v39 = vmin.f32 %v935_v38, %v977_v18  ;;  %v981_v51 = vrot.slane %v442_v34, 4  ;;  %v1719_v52 = vmin.f32 %v347_v43, %v1711_v36  ;;  %v548_v53 = vrot.slane %v443_v46, 1  ;;  %v1742_v34 = vld [vmem:[#allocation2 + $0xd8] sm:$0xff] }
  0x57   :  { %v1081_v55 = vmin.f32 %v936_v48, %v980_v31  ;;  %v547_v56 = vsel %vm527_vm0, %v544_v58, %v546_v41  ;;  %v692_v10 = vsel %vm672_vm1, %v689_v59, %v691_v35  ;;  %v837_v9 = vsel %vm817_vm2, %v834_v57, %v836_v49  ;;  %v1749_v41 = vld [vmem:[#allocation2 + $0xe0] sm:$0xff] }
  0x58   :  { %vm1112_vm9 = vcmp.ge.f32.partialorder %v1080_v39, 0.014222222  ;;  %v647_v60 = vmin.f32 %v1681_v45, %v547_v56  ;;  %v982_v61 = vsel %vm962_vm3, %v979_v2, %v981_v51  ;;  %v549_v62 = vrot.slane %v1719_v52, 1 }
  0x59   :  { %v1370_v14 = vsel %vm1112_vm9, 1.0, %v1504_v50  ;;  %vm1113_vm10 = vcmp.ge.f32.partialorder %v1081_v55, 0.014222222  ;;  %v693_v63 = vrot.slane %v443_v46, 2  ;;  %v694_v0 = vrot.slane %v1719_v52, 2 }
  0x5a   :  { %v1240_v1 = vmul.f32 %v1370_v14, %v1208_v54  ;;  %v1315_v58 = vadd.f32 %v1370_v14, %v1314_v4  ;;  %v1371_v59 = vsel %vm1113_vm10, 1.0, %v1504_v50  ;;  %v792_v3 = vmin.f32 %v647_v60, %v692_v10  ;;  %v60_v4 = vld [vmem:[#allocation2 + $0x88] sm:$0xf]  ;;  %v1211_v54 = vld [vmem:[#allocation5 + $0x40] sm:$0xff] }
  0x5b   :  { %v1241_v12 = vmul.f32 %v1371_v59, %v1209_v27  ;;  %v1301_v13 = vadd.f32 %v1371_v59, %v1300_v11  ;;  %v550_v45 = vsel %vm527_vm0, %v548_v53, %v549_v62  ;;  %v695_v15 = vsel %vm672_vm1, %v693_v63, %v694_v0 }
  0x5c   :  { %1272 = vst [vmem:[#allocation7 + $0x28] sm:$0xff] %v1240_v1  ;;  %v937_v18 = vmin.f32 %v792_v3, %v837_v9  ;;  %v648_v21 = vmin.f32 %v443_v46, %v550_v45  ;;  %v838_v8 = vrot.slane %v443_v46, 3  ;;  %v839_v6 = vrot.slane %v1719_v52, 3 }
  0x5d   :  { %1273 = vst [vmem:[#allocation7 + $0x30] sm:$0xff] %v1241_v12  ;;  %v983_v57 = vrot.slane %v443_v46, 4  ;;  %v984_v40 = vrot.slane %v1719_v52, 4  ;;  %v251_v11 = vmin.f32 %v154_v37, %v203_v7  ;;  %v252_v28 = vmin.f32 %v155_v47, %v1667_v29 }
  0x5e   :  { %v1082_v25 = vmin.f32 %v937_v18, %v982_v61  ;;  %v793_v24 = vmin.f32 %v648_v21, %v695_v15  ;;  %v840_v2 = vsel %vm817_vm2, %v838_v8, %v839_v6  ;;  %v253_v31 = vmin.f32 %v156_v23, %v1673_v32  ;;  %v400_v21 = vld [vmem:[#allocation2 + $0xe8] sm:$0xf] }
  0x5f   :  { %v985_v30 = vsel %vm962_vm3, %v983_v57, %v984_v40  ;;  %v348_v17 = vmin.f32 %v251_v11, %v300_v16  ;;  %v157_v37 = vmin.f32 %v60_v4, %v109_v22  ;;  %v349_v33 = vmin.f32 %v252_v28, %v1705_v5  ;;  %v63_v22 = vld [vmem:[#allocation2 + $0xa0] sm:$0xf] }
  0x60   :  { %vm1114_vm11 = vcmp.ge.f32.partialorder %v1082_v25, 0.014222222  ;;  %v938_v38 = vmin.f32 %v793_v24, %v840_v2  ;;  %v158_v43 = vmin.f32 %v1611_v19, %v1667_v29  ;;  %v350_v48 = vmin.f32 %v253_v31, %v1711_v36 }
  0x61   :  { %v1372_v46 = vsel %vm1114_vm11, 1.0, %v1504_v50  ;;  %v445_v47 = vmin.f32 %v348_v17, %v397_v26  ;;  %v254_v35 = vmin.f32 %v157_v37, %v206_v44  ;;  %v446_v53 = vmin.f32 %v349_v33, %v1742_v34  ;;  %v1212_v37 = vld [vmem:[#allocation5 + $0x48] sm:$0xff] }
  0x62   :  { %v1242_v49 = vmul.f32 %v1372_v46, %v1210_v42  ;;  %v1751_v39 = vadd.f32 %v1372_v46, %v1315_v58  ;;  %v1083_v51 = vmin.f32 %v938_v38, %v985_v30  ;;  %v447_v19 = vmin.f32 %v350_v48, %v1749_v41  ;;  %v303_v58 = vld [vmem:[#allocation2 + $0xd0] sm:$0xf] }
  0x63   :  { %v551_v55 = vrot.slane %v445_v47, 1  ;;  %v696_v56 = vrot.slane %v445_v47, 2  ;;  %v841_v10 = vrot.slane %v445_v47, 3  ;;  %v986_v9 = vrot.slane %v445_v47, 4  ;;  %v1777_v47 = vld [vmem:[#allocation2 + $0xf0] sm:$0xff] }
  0x64   :  { %1274 = vst [vmem:[#allocation7 + $0x38] sm:$0xff] %v1242_v49  ;;  %vm1115_vm12 = vcmp.ge.f32.partialorder %v1083_v51, 0.014222222  ;;  %v553_v27 = vrot.slane %v446_v53, 1  ;;  %v698_v60 = vrot.slane %v446_v53, 2  ;;  %v554_v45 = vrot.slane %v447_v19, 1 }
  0x65   :  { %v1373_v61 = vsel %vm1115_vm12, 1.0, %v1504_v50  ;;  %v552_v14 = vsel %vm527_vm0, %v549_v62, %v551_v55  ;;  %v697_v63 = vsel %vm672_vm1, %v694_v0, %v696_v56  ;;  %v842_v1 = vsel %vm817_vm2, %v839_v6, %v841_v10  ;;  %v112_v6 = vld [vmem:[#allocation2 + $0xb8] sm:$0xf]  ;;  %v209_v49 = vld [vmem:[#allocation2 + $0xd0] sm:$0xf] }
  0x66   :  { %v1243_v59 = vmul.f32 %v1373_v61, %v1211_v54  ;;  %v1761_v3 = vadd.f32 %v1373_v61, %v1301_v13  ;;  %v649_v7 = vmin.f32 %v1719_v52, %v552_v14  ;;  %v987_v12 = vsel %vm962_vm3, %v984_v40, %v986_v9 }
  0x67   :  { %v699_v15 = vrot.slane %v447_v19, 2  ;;  %v843_v16 = vrot.slane %v446_v53, 3  ;;  %v844_v18 = vrot.slane %v447_v19, 3  ;;  %v988_v62 = vrot.slane %v446_v53, 4 }
  0x68   :  { %1275 = vst [vmem:[#allocation7 + $0x40] sm:$0xff] %v1243_v59  ;;  %v794_v8 = vmin.f32 %v649_v7, %v697_v63  ;;  %v989_v4 = vrot.slane %v447_v19, 4  ;;  %v351_v0 = vmin.f32 %v254_v35, %v303_v58  ;;  %v555_v57 = vsel %vm527_vm0, %v553_v27, %v554_v45 }
  0x69   :  { %v700_v13 = vsel %vm672_vm1, %v698_v60, %v699_v15  ;;  %v845_v52 = vsel %vm817_vm2, %v843_v16, %v844_v18  ;;  %v159_v40 = vmin.f32 %v1613_v20, %v1673_v32  ;;  %v650_v23 = vmin.f32 %v446_v53, %v555_v57  ;;  %v1213_v60 = vld [vmem:[#allocation5 + $0x50] sm:$0xff]  ;;  %v403_v57 = vld [vmem:[#allocation2 + $0x100] sm:$0xf] }
  0x6a   :  { %v939_v11 = vmin.f32 %v794_v8, %v842_v1  ;;  %v990_v25 = vsel %vm962_vm3, %v988_v62, %v989_v4  ;;  %v448_v24 = vmin.f32 %v351_v0, %v400_v21  ;;  %v255_v2 = vmin.f32 %v158_v43, %v1705_v5  ;;  %v115_v62 = vld [vmem:[#allocation2 + $0xd0] sm:$0xf] }
  0x6b   :  { %v256_v26 = vmin.f32 %v159_v40, %v1711_v36  ;;  %v160_v28 = vmin.f32 %v63_v22, %v112_v6  ;;  %v161_v44 = vmin.f32 %v1667_v29, %v1705_v5  ;;  %v795_v30 = vmin.f32 %v650_v23, %v700_v13  ;;  %v1781_v29 = vld [vmem:[#allocation2 + $0xf8] sm:$0xff]  ;;  %v212_v23 = vld [vmem:[#allocation2 + $0xe8] sm:$0xf] }
  0x6c   :  { %v1084_v42 = vmin.f32 %v939_v11, %v987_v12  ;;  %v556_v17 = vrot.slane %v448_v24, 1  ;;  %v701_v31 = vrot.slane %v448_v24, 2  ;;  %v846_v38 = vrot.slane %v448_v24, 3  ;;  %v1214_v13 = vld [vmem:[#allocation5 + $0x58] sm:$0xff] }
  0x6d   :  { %v991_v20 = vrot.slane %v448_v24, 4  ;;  %v352_v33 = vmin.f32 %v255_v2, %v1742_v34  ;;  %v353_v46 = vmin.f32 %v256_v26, %v1749_v41  ;;  %v940_v43 = vmin.f32 %v795_v30, %v845_v52 }
  0x6e   :  { %vm1116_vm13 = vcmp.ge.f32.partialorder %v1084_v42, 0.014222222  ;;  %v557_v48 = vsel %vm527_vm0, %v554_v45, %v556_v17  ;;  %v702_v35 = vsel %vm672_vm1, %v699_v15, %v701_v31  ;;  %v847_v54 = vsel %vm817_vm2, %v844_v18, %v846_v38  ;;  %v306_v15 = vld [vmem:[#allocation2 + $0xe8] sm:$0xf]  ;;  %v1809_v31 = vld [vmem:[#allocation2 + $0x110] sm:$0xff] }
  0x6f   :  { %v1374_v51 = vsel %vm1116_vm13, 1.0, %v1504_v50  ;;  %v651_v53 = vmin.f32 %v447_v19, %v557_v48  ;;  %v992_v55 = vsel %vm962_vm3, %v989_v4, %v991_v20  ;;  %v1085_v9 = vmin.f32 %v940_v43, %v990_v25  ;;  %v1807_v17 = vld [vmem:[#allocation2 + $0x108] sm:$0xff] }
  0x70   :  { %v1244_v56 = vmul.f32 %v1374_v51, %v1212_v37  ;;  %v1317_v10 = vadd.f32 %v1374_v51, %v1751_v39  ;;  %v449_v27 = vmin.f32 %v352_v33, %v1777_v47  ;;  %v1789_v14 = vmin.f32 %v353_v46, %v1781_v29  ;;  %v309_v37 = vld [vmem:[#allocation2 + $0x100] sm:$0xf] }
  0x71   :  { %v796_v61 = vmin.f32 %v651_v53, %v702_v35  ;;  %v257_v63 = vmin.f32 %v160_v28, %v209_v49  ;;  %v162_v1 = vmin.f32 %v1673_v32, %v1711_v36  ;;  %vm1117_vm14 = vcmp.ge.f32.partialorder %v1085_v9, 0.014222222  ;;  %v66_v32 = vld [vmem:[#allocation2 + $0xb8] sm:$0xf] }
  0x72   :  { %1276 = vst [vmem:[#allocation7 + $0x48] sm:$0xff] %v1244_v56  ;;  %v558_v19 = vrot.slane %v449_v27, 1  ;;  %v703_v58 = vrot.slane %v449_v27, 2  ;;  %v848_v59 = vrot.slane %v449_v27, 3  ;;  %v1375_v7 = vsel %vm1117_vm14, 1.0, %v1504_v50 }
  0x73   :  { %v941_v39 = vmin.f32 %v796_v61, %v847_v54  ;;  %v559_v12 = vrot.slane %v1789_v14, 1  ;;  %v704_v45 = vrot.slane %v1789_v14, 2  ;;  %v1245_v16 = vmul.f32 %v1375_v7, %v1213_v60 }
  0x74   :  { %v1303_v18 = vadd.f32 %v1375_v7, %v1761_v3  ;;  %v849_v21 = vrot.slane %v1789_v14, 3  ;;  %v993_v8 = vrot.slane %v449_v27, 4  ;;  %v994_v6 = vrot.slane %v1789_v14, 4 }
  0x75   :  { %v1086_v4 = vmin.f32 %v941_v39, %v992_v55  ;;  %v560_v0 = vsel %vm527_vm0, %v558_v19, %v559_v12  ;;  %v705_v22 = vsel %vm672_vm1, %v703_v58, %v704_v45  ;;  %1277 = vst [vmem:[#allocation7 + $0x50] sm:$0xff] %v1245_v16  ;;  %v354_v11 = vmin.f32 %v257_v63, %v306_v15  ;;  %v406_v15 = vld [vmem:[#allocation2 + $0x118] sm:$0xf] }
  0x76   :  { %v652_v52 = vmin.f32 %v449_v27, %v560_v0  ;;  %v850_v40 = vsel %vm817_vm2, %v848_v59, %v849_v21  ;;  %v258_v3 = vmin.f32 %v161_v44, %v1742_v34  ;;  %v995_v25 = vsel %vm962_vm3, %v993_v8, %v994_v6  ;;  %v1215_v27 = vld [vmem:[#allocation5 + $0x60] sm:$0xff] }
  0x77   :  { %vm1118_vm15 = vcmp.ge.f32.partialorder %v1086_v4, 0.014222222  ;;  %v259_v24 = vmin.f32 %v162_v1, %v1749_v41  ;;  %v163_v2 = vmin.f32 %v66_v32, %v115_v62  ;;  %v451_v42 = vmin.f32 %v354_v11, %v403_v57  ;;  %v69_v32 = vld [vmem:[#allocation2 + $0xd0] sm:$0xf]  ;;  %v118_v62 = vld [vmem:[#allocation2 + $0xe8] sm:$0xf] }
  0x78   :  { %v1376_v26 = vsel %vm1118_vm15, 1.0, %v1504_v50  ;;  %v797_v28 = vmin.f32 %v652_v52, %v705_v22  ;;  %v355_v30 = vmin.f32 %v258_v3, %v1777_v47  ;;  %v164_v52 = vmin.f32 %v1705_v5, %v1742_v34 }
  0x79   :  { %v1246_v38 = vmul.f32 %v1376_v26, %v1214_v13  ;;  %v1811_v44 = vadd.f32 %v1376_v26, %v1317_v10  ;;  %v356_v20 = vmin.f32 %v259_v24, %v1781_v29  ;;  %v260_v33 = vmin.f32 %v163_v2, %v212_v23 }
  0x7a   :  { %v942_v46 = vmin.f32 %v797_v28, %v850_v40  ;;  %v561_v43 = vrot.slane %v451_v42, 1  ;;  %v706_v48 = vrot.slane %v451_v42, 2  ;;  %v851_v35 = vrot.slane %v451_v42, 3 }
  0x7b   :  { %1278 = vst [vmem:[#allocation7 + $0x58] sm:$0xff] %v1246_v38  ;;  %v996_v49 = vrot.slane %v451_v42, 4  ;;  %v452_v51 = vmin.f32 %v355_v30, %v1807_v17  ;;  %v1816_v53 = vmin.f32 %v356_v20, %v1809_v31  ;;  %v357_v54 = vmin.f32 %v260_v33, %v309_v37  ;;  %v215_v33 = vld [vmem:[#allocation2 + $0x100] sm:$0xf] }
  0x7c   :  { %v1087_v55 = vmin.f32 %v942_v46, %v995_v25  ;;  %v562_v56 = vsel %vm527_vm0, %v559_v12, %v561_v43  ;;  %v707_v10 = vsel %vm672_vm1, %v704_v45, %v706_v48  ;;  %v852_v9 = vsel %vm817_vm2, %v849_v21, %v851_v35  ;;  %v1216_v25 = vld [vmem:[#allocation5 + $0x68] sm:$0xff]  ;;  %v1217_v43 = vld [vmem:[#allocation5 + $0x70] sm:$0xff] }
  0x7d   :  { %v653_v60 = vmin.f32 %v1789_v14, %v562_v56  ;;  %v997_v61 = vsel %vm962_vm3, %v994_v6, %v996_v49  ;;  %v563_v63 = vrot.slane %v452_v51, 1  ;;  %v564_v1 = vrot.slane %v1816_v53, 1  ;;  %v1846_v49 = vld [vmem:[#allocation2 + $0x120] sm:$0xff] }
  0x7e   :  { %vm1119_vm4 = vcmp.ge.f32.partialorder %v1087_v55, 0.014222222  ;;  %v708_v19 = vrot.slane %v452_v51, 2  ;;  %v709_v58 = vrot.slane %v1816_v53, 2  ;;  %v853_v59 = vrot.slane %v452_v51, 3 }
  0x7f   :  { %v1377_v7 = vsel %vm1119_vm4, 1.0, %v1504_v50  ;;  %v798_v39 = vmin.f32 %v653_v60, %v707_v10  ;;  %v565_v12 = vsel %vm527_vm0, %v563_v63, %v564_v1  ;;  %v854_v45 = vrot.slane %v1816_v53, 3  ;;  %v312_v10 = vld [vmem:[#allocation2 + $0x118] sm:$0xf] }
  0x80   :  { %v1247_v16 = vmul.f32 %v1377_v7, %v1215_v27  ;;  %v1304_v14 = vadd.f32 %v1377_v7, %v1303_v18  ;;  %v654_v21 = vmin.f32 %v452_v51, %v565_v12  ;;  %v710_v8 = vsel %vm672_vm1, %v708_v19, %v709_v58 }
  0x81   :  { %v943_v4 = vmin.f32 %v798_v39, %v852_v9  ;;  %v855_v0 = vsel %vm817_vm2, %v853_v59, %v854_v45  ;;  %v998_v22 = vrot.slane %v452_v51, 4  ;;  %v999_v6 = vrot.slane %v1816_v53, 4  ;;  %v1848_v51 = vld [vmem:[#allocation2 + $0x128] sm:$0xff]  ;;  %v409_v59 = vld [vmem:[#allocation2 + $0x130] sm:$0xf] }
  0x82   :  { %1279 = vst [vmem:[#allocation7 + $0x60] sm:$0xff] %v1247_v16  ;;  %v799_v57 = vmin.f32 %v654_v21, %v710_v8  ;;  %v454_v13 = vmin.f32 %v357_v54, %v406_v15  ;;  %v165_v18 = vmin.f32 %v1711_v36, %v1749_v41  ;;  %v166_v3 = vmin.f32 %v69_v32, %v118_v62  ;;  %v1218_v32 = vld [vmem:[#allocation5 + $0x78] sm:$0xff] }
  0x83   :  { %v1088_v40 = vmin.f32 %v943_v4, %v997_v61  ;;  %v1000_v11 = vsel %vm962_vm3, %v998_v22, %v999_v6  ;;  %v167_v23 = vmin.f32 %v1742_v34, %v1777_v47  ;;  %v261_v30 = vmin.f32 %v164_v52, %v1777_v47 }
  0x84   :  { %v944_v24 = vmin.f32 %v799_v57, %v855_v0  ;;  %v566_v2 = vrot.slane %v454_v13, 1  ;;  %v711_v26 = vrot.slane %v454_v13, 2  ;;  %v856_v28 = vrot.slane %v454_v13, 3 }
  0x85   :  { %vm1120_vm5 = vcmp.ge.f32.partialorder %v1088_v40, 0.014222222  ;;  %v1001_v42 = vrot.slane %v454_v13, 4  ;;  %v262_v5 = vmin.f32 %v165_v18, %v1781_v29  ;;  %v358_v55 = vmin.f32 %v261_v30, %v1807_v17 }
  0x86   :  { %v1378_v36 = vsel %vm1120_vm5, 1.0, %v1504_v50  ;;  %v1089_v37 = vmin.f32 %v944_v24, %v1000_v11  ;;  %v567_v38 = vsel %vm527_vm0, %v564_v1, %v566_v2  ;;  %v712_v20 = vsel %vm672_vm1, %v709_v58, %v711_v26  ;;  %v1872_v26 = vld [vmem:[#allocation2 + $0x140] sm:$0xff] }
  0x87   :  { %v1248_v34 = vmul.f32 %v1378_v36, %v1216_v25  ;;  %v1319_v46 = vadd.f32 %v1378_v36, %v1811_v44  ;;  %v655_v48 = vmin.f32 %v1816_v53, %v567_v38  ;;  %v857_v35 = vsel %vm817_vm2, %v854_v45, %v856_v28  ;;  %v72_v28 = vld [vmem:[#allocation2 + $0xe8] sm:$0xf] }
  0x88   :  { %vm1121_vm6 = vcmp.ge.f32.partialorder %v1089_v37, 0.014222222  ;;  %v1002_v54 = vsel %vm962_vm3, %v999_v6, %v1001_v42  ;;  %v359_v56 = vmin.f32 %v262_v5, %v1809_v31  ;;  %v263_v27 = vmin.f32 %v166_v3, %v215_v33  ;;  %v1868_v3 = vld [vmem:[#allocation2 + $0x138] sm:$0xff]  ;;  %v121_v42 = vld [vmem:[#allocation2 + $0x100] sm:$0xf] }
  0x89   :  { %1280 = vst [vmem:[#allocation7 + $0x68] sm:$0xff] %v1248_v34  ;;  %v1379_v44 = vsel %vm1121_vm6, 1.0, %v1504_v50  ;;  %v800_v9 = vmin.f32 %v655_v48, %v712_v20  ;;  %v168_v53 = vmin.f32 %v1749_v41, %v1781_v29  ;;  %v455_v63 = vmin.f32 %v358_v55, %v1846_v49 }
  0x8a   :  { %v1249_v60 = vmul.f32 %v1379_v44, %v1217_v43  ;;  %v1856_v61 = vadd.f32 %v1379_v44, %v1304_v14  ;;  %v456_v1 = vmin.f32 %v359_v56, %v1848_v51  ;;  %v360_v58 = vmin.f32 %v263_v27, %v312_v10  ;;  %v1219_v44 = vld [vmem:[#allocation5 + $0x80] sm:$0xff] }
  0x8b   :  { %v945_v19 = vmin.f32 %v800_v9, %v857_v35  ;;  %v264_v7 = vmin.f32 %v167_v23, %v1807_v17  ;;  %v265_v39 = vmin.f32 %v168_v53, %v1809_v31  ;;  %v568_v12 = vrot.slane %v455_v63, 1 }
  0x8c   :  { %1281 = vst [vmem:[#allocation7 + $0x70] sm:$0xff] %v1249_v60  ;;  %v569_v45 = vrot.slane %v456_v1, 1  ;;  %v713_v15 = vrot.slane %v455_v63, 2  ;;  %v714_v16 = vrot.slane %v456_v1, 2  ;;  %v858_v21 = vrot.slane %v455_v63, 3 }
  0x8d   :  { %v1090_v41 = vmin.f32 %v945_v19, %v1002_v54  ;;  %v859_v14 = vrot.slane %v456_v1, 3  ;;  %v1003_v8 = vrot.slane %v455_v63, 4  ;;  %v1004_v0 = vrot.slane %v456_v1, 4 }
  0x8e   :  { %v570_v62 = vsel %vm527_vm0, %v568_v12, %v569_v45  ;;  %v715_v4 = vsel %vm672_vm1, %v713_v15, %v714_v16  ;;  %v457_v22 = vmin.f32 %v360_v58, %v409_v59  ;;  %v361_v13 = vmin.f32 %v264_v7, %v1846_v49  ;;  %v218_v58 = vld [vmem:[#allocation2 + $0x118] sm:$0xf]  ;;  %v75_v12 = vld [vmem:[#allocation2 + $0x100] sm:$0xf] }
  0x8f   :  { %vm1122_vm7 = vcmp.ge.f32.partialorder %v1090_v41, 0.014222222  ;;  %v656_v6 = vmin.f32 %v455_v63, %v570_v62  ;;  %v860_v57 = vsel %vm817_vm2, %v858_v21, %v859_v14  ;;  %v1005_v18 = vsel %vm962_vm3, %v1003_v8, %v1004_v0  ;;  %v1220_v8 = vld [vmem:[#allocation5 + $0x88] sm:$0xff] }
  0x90   :  { %v1380_v52 = vsel %vm1122_vm7, 1.0, %v1504_v50  ;;  %v571_v40 = vrot.slane %v457_v22, 1  ;;  %v716_v11 = vrot.slane %v457_v22, 2  ;;  %v861_v2 = vrot.slane %v457_v22, 3 }
  0x91   :  { %v1250_v23 = vmul.f32 %v1380_v52, %v1218_v32  ;;  %v1870_v25 = vadd.f32 %v1380_v52, %v1319_v46  ;;  %v801_v24 = vmin.f32 %v656_v6, %v715_v4  ;;  %v1006_v36 = vrot.slane %v457_v22, 4  ;;  %v221_v22 = vld [vmem:[#allocation2 + $0x130] sm:$0xf] }
  0x92   :  { %v572_v30 = vsel %vm527_vm0, %v569_v45, %v571_v40  ;;  %v717_v5 = vsel %vm672_vm1, %v714_v16, %v716_v11  ;;  %v362_v37 = vmin.f32 %v265_v39, %v1848_v51  ;;  %v862_v33 = vsel %vm817_vm2, %v859_v14, %v861_v2  ;;  %v124_v45 = vld [vmem:[#allocation2 + $0x118] sm:$0xf]  ;;  %v315_v14 = vld [vmem:[#allocation2 + $0x130] sm:$0xf] }
  0x93   :  { %1282 = vst [vmem:[#allocation7 + $0x78] sm:$0xff] %v1250_v23  ;;  %v946_v38 = vmin.f32 %v801_v24, %v860_v57  ;;  %v657_v20 = vmin.f32 %v456_v1, %v572_v30  ;;  %v458_v34 = vmin.f32 %v361_v13, %v1868_v3  ;;  %v1007_v46 = vsel %vm962_vm3, %v1004_v0, %v1006_v36  ;;  %v1908_v57 = vld [vmem:[#allocation2 + $0x150] sm:$0xff]  ;;  %v318_v23 = vld [vmem:[#allocation2 + $0x148] sm:$0xf]  ;;  %v1919_v36 = vld [vmem:[#allocation2 + $0x158] sm:$0xff] }
  0x94   :  { %v1881_v43 = vmin.f32 %v362_v37, %v1872_v26  ;;  %v169_v48 = vmin.f32 %v72_v28, %v121_v42  ;;  %v170_v35 = vmin.f32 %v1777_v47, %v1807_v17  ;;  %v171_v4 = vmin.f32 %v1781_v29, %v1809_v31 }
  0x95   :  { %v1091_v54 = vmin.f32 %v946_v38, %v1005_v18  ;;  %v802_v55 = vmin.f32 %v657_v20, %v717_v5  ;;  %v573_v56 = vrot.slane %v458_v34, 1  ;;  %v718_v10 = vrot.slane %v458_v34, 2 }
  0x96   :  { %v574_v9 = vrot.slane %v1881_v43, 1  ;;  %v719_v27 = vrot.slane %v1881_v43, 2  ;;  %v863_v53 = vrot.slane %v458_v34, 3  ;;  %v864_v60 = vrot.slane %v1881_v43, 3 }
  0x97   :  { %vm1123_vm8 = vcmp.ge.f32.partialorder %v1091_v54, 0.014222222  ;;  %v947_v63 = vmin.f32 %v802_v55, %v862_v33  ;;  %v1008_v1 = vrot.slane %v458_v34, 4  ;;  %v1009_v19 = vrot.slane %v1881_v43, 4  ;;  %v78_v33 = vld [vmem:[#allocation2 + $0x118] sm:$0xf] }
  0x98   :  { %v1381_v47 = vsel %vm1123_vm8, 1.0, %v1504_v50  ;;  %v575_v59 = vsel %vm527_vm0, %v573_v56, %v574_v9  ;;  %v720_v7 = vsel %vm672_vm1, %v718_v10, %v719_v27  ;;  %v865_v39 = vsel %vm817_vm2, %v863_v53, %v864_v60  ;;  %v127_v54 = vld [vmem:[#allocation2 + $0x130] sm:$0xf] }
  0x99   :  { %v1251_v15 = vmul.f32 %v1381_v47, %v1219_v44  ;;  %v1900_v16 = vadd.f32 %v1381_v47, %v1856_v61  ;;  %v1092_v41 = vmin.f32 %v947_v63, %v1007_v46  ;;  %v658_v21 = vmin.f32 %v458_v34, %v575_v59  ;;  %v412_v61 = vld [vmem:[#allocation2 + $0x148] sm:$0xf]  ;;  %v1221_v34 = vld [vmem:[#allocation5 + $0x90] sm:$0xff] }
  0x9a   :  { %v1010_v32 = vsel %vm962_vm3, %v1008_v1, %v1009_v19  ;;  %v266_v62 = vmin.f32 %v169_v48, %v218_v58  ;;  %v267_v0 = vmin.f32 %v170_v35, %v1846_v49  ;;  %v172_v13 = vmin.f32 %v75_v12, %v124_v45  ;;  %v415_v1 = vld [vmem:[#allocation2 + $0x160] sm:$0xf] }
  0x9b   :  { %1283 = vst [vmem:[#allocation7 + $0x80] sm:$0xff] %v1251_v15  ;;  %vm1124_vm9 = vcmp.ge.f32.partialorder %v1092_v41, 0.014222222  ;;  %v803_v6 = vmin.f32 %v658_v21, %v720_v7  ;;  %v173_v52 = vmin.f32 %v1807_v17, %v1846_v49  ;;  %v268_v11 = vmin.f32 %v171_v4, %v1848_v51 }
  0x9c   :  { %v1382_v18 = vsel %vm1124_vm9, 1.0, %v1504_v50  ;;  %v363_v40 = vmin.f32 %v266_v62, %v315_v14  ;;  %v364_v29 = vmin.f32 %v267_v0, %v1868_v3  ;;  %v269_v42 = vmin.f32 %v172_v13, %v221_v22 }
  0x9d   :  { %v1252_v24 = vmul.f32 %v1382_v18, %v1220_v8  ;;  %v1916_v2 = vadd.f32 %v1382_v18, %v1870_v25  ;;  %v948_v28 = vmin.f32 %v803_v6, %v865_v39  ;;  %v365_v5 = vmin.f32 %v268_v11, %v1872_v26 }
  0x9e   :  { %v460_v30 = vmin.f32 %v363_v40, %v412_v61  ;;  %v461_v17 = vmin.f32 %v364_v29, %v1908_v57  ;;  %v366_v38 = vmin.f32 %v269_v42, %v318_v23  ;;  %v174_v20 = vmin.f32 %v1809_v31, %v1848_v51  ;;  %v224_v23 = vld [vmem:[#allocation2 + $0x148] sm:$0xf] }
  0x9f   :  { %1284 = vst [vmem:[#allocation7 + $0x88] sm:$0xff] %v1252_v24  ;;  %v1093_v37 = vmin.f32 %v948_v28, %v1010_v32  ;;  %v270_v35 = vmin.f32 %v173_v52, %v1868_v3  ;;  %v462_v56 = vmin.f32 %v365_v5, %v1919_v36  ;;  %v175_v7 = vmin.f32 %v78_v33, %v127_v54  ;;  %v1950_v52 = vld [vmem:[#allocation2 + $0x170] sm:$0xff]  ;;  %v1222_v24 = vld [vmem:[#allocation5 + $0x98] sm:$0xff] }
  0xa0   :  { %v576_v46 = vrot.slane %v460_v30, 1  ;;  %v721_v25 = vrot.slane %v460_v30, 2  ;;  %v866_v48 = vrot.slane %v460_v30, 3  ;;  %v1011_v55 = vrot.slane %v460_v30, 4 }
  0xa1   :  { %vm1125_vm10 = vcmp.ge.f32.partialorder %v1093_v37, 0.014222222  ;;  %v578_v10 = vrot.slane %v461_v17, 1  ;;  %v723_v63 = vrot.slane %v461_v17, 2  ;;  %v579_v39 = vrot.slane %v462_v56, 1 }
  0xa2   :  { %v1927_v44 = vsel %vm1125_vm10, 1.0, %v1504_v50  ;;  %v577_v31 = vsel %vm527_vm0, %v574_v9, %v576_v46  ;;  %v722_v53 = vsel %vm672_vm1, %v719_v27, %v721_v25  ;;  %v867_v59 = vsel %vm817_vm2, %v864_v60, %v866_v48 }
  0xa3   :  { %v1253_v58 = vmul.f32 %v1927_v44, %v1221_v34  ;;  %v659_v47 = vmin.f32 %v1881_v43, %v577_v31  ;;  %v724_v12 = vrot.slane %v462_v56, 2  ;;  %v868_v45 = vrot.slane %v461_v17, 3 }
  0xa4   :  { %v869_v15 = vrot.slane %v462_v56, 3  ;;  %v1012_v27 = vsel %vm962_vm3, %v1009_v19, %v1011_v55  ;;  %v1013_v41 = vrot.slane %v461_v17, 4  ;;  %v463_v21 = vmin.f32 %v366_v38, %v415_v1  ;;  %v1948_v19 = vld [vmem:[#allocation2 + $0x168] sm:$0xff]  ;;  %v1223_v55 = vld [vmem:[#allocation5 + $0xa0] sm:$0xff] }
  0xa5   :  { %1285 = vst [vmem:[#allocation7 + $0x90] sm:$0xff] %v1253_v58  ;;  %v804_v9 = vmin.f32 %v659_v47, %v722_v53  ;;  %v580_v14 = vsel %vm527_vm0, %v578_v10, %v579_v39  ;;  %v725_v8 = vsel %vm672_vm1, %v723_v63, %v724_v12  ;;  %v1014_v32 = vrot.slane %v462_v56, 4  ;;  %v321_v63 = vld [vmem:[#allocation2 + $0x160] sm:$0xf] }
  0xa6   :  { %v271_v60 = vmin.f32 %v174_v20, %v1872_v26  ;;  %v660_v4 = vmin.f32 %v461_v17, %v580_v14  ;;  %v870_v0 = vsel %vm817_vm2, %v868_v45, %v869_v15  ;;  %v581_v22 = vrot.slane %v463_v21, 1  ;;  %v130_v45 = vld [vmem:[#allocation2 + $0x148] sm:$0xf] }
  0xa7   :  { %v949_v62 = vmin.f32 %v804_v9, %v867_v59  ;;  %v726_v6 = vrot.slane %v463_v21, 2  ;;  %v871_v61 = vrot.slane %v463_v21, 3  ;;  %v1016_v13 = vrot.slane %v463_v21, 4  ;;  %v1224_v9 = vld [vmem:[#allocation5 + $0xa8] sm:$0xff]  ;;  %v418_v21 = vld [vmem:[#allocation2 + $0x178] sm:$0xf] }
  0xa8   :  { %v367_v43 = vmin.f32 %v270_v35, %v1908_v57  ;;  %v805_v40 = vmin.f32 %v660_v4, %v725_v8  ;;  %v582_v11 = vsel %vm527_vm0, %v579_v39, %v581_v22  ;;  %v368_v29 = vmin.f32 %v271_v60, %v1919_v36  ;;  %v227_v60 = vld [vmem:[#allocation2 + $0x160] sm:$0xf] }
  0xa9   :  { %v1094_v18 = vmin.f32 %v949_v62, %v1012_v27  ;;  %v1015_v28 = vsel %vm962_vm3, %v1013_v41, %v1014_v32  ;;  %v661_v42 = vmin.f32 %v462_v56, %v582_v11  ;;  %v727_v30 = vsel %vm672_vm1, %v724_v12, %v726_v6  ;;  %v81_v12 = vld [vmem:[#allocation2 + $0x130] sm:$0xf] }
  0xaa   :  { %v872_v5 = vsel %vm817_vm2, %v869_v15, %v871_v61  ;;  %v950_v17 = vmin.f32 %v805_v40, %v870_v0  ;;  %v464_v37 = vmin.f32 %v367_v43, %v1948_v19  ;;  %v1959_v38 = vmin.f32 %v368_v29, %v1950_v52 }
  0xab   :  { %vm1126_vm11 = vcmp.ge.f32.partialorder %v1094_v18, 0.014222222  ;;  %v806_v33 = vmin.f32 %v661_v42, %v727_v30  ;;  %v1017_v34 = vsel %vm962_vm3, %v1014_v32, %v1016_v13  ;;  %v272_v46 = vmin.f32 %v175_v7, %v224_v23  ;;  %v1986_v18 = vld [vmem:[#allocation2 + $0x180] sm:$0xff]  ;;  %v324_v23 = vld [vmem:[#allocation2 + $0x178] sm:$0xf] }
  0xac   :  { %v1384_v20 = vsel %vm1126_vm11, 1.0, %v1504_v50  ;;  %v1095_v48 = vmin.f32 %v950_v17, %v1015_v28  ;;  %v583_v35 = vrot.slane %v464_v37, 1  ;;  %v176_v54 = vmin.f32 %v1846_v49, %v1868_v3 }
  0xad   :  { %v1254_v25 = vmul.f32 %v1384_v20, %v1222_v24  ;;  %v951_v56 = vmin.f32 %v806_v33, %v872_v5  ;;  %v584_v10 = vrot.slane %v1959_v38, 1  ;;  %v728_v31 = vrot.slane %v464_v37, 2  ;;  %v1225_v33 = vld [vmem:[#allocation5 + $0xb0] sm:$0xff] }
  0xae   :  { %v729_v53 = vrot.slane %v1959_v38, 2  ;;  %vm1127_vm12 = vcmp.ge.f32.partialorder %v1095_v48, 0.014222222  ;;  %v873_v1 = vrot.slane %v464_v37, 3  ;;  %v874_v58 = vrot.slane %v1959_v38, 3 }
  0xaf   :  { %1286 = vst [vmem:[#allocation7 + $0x98] sm:$0xff] %v1254_v25  ;;  %v1018_v47 = vrot.slane %v464_v37, 4  ;;  %v1969_v59 = vsel %vm1127_vm12, 1.0, %v1504_v50  ;;  %v1096_v7 = vmin.f32 %v951_v56, %v1017_v34  ;;  %v585_v49 = vsel %vm527_vm0, %v583_v35, %v584_v10 }
  0xb0   :  { %v730_v39 = vsel %vm672_vm1, %v728_v31, %v729_v53  ;;  %v1255_v15 = vmul.f32 %v1969_v59, %v1223_v55  ;;  %v662_v27 = vmin.f32 %v464_v37, %v585_v49  ;;  %v875_v41 = vsel %vm817_vm2, %v873_v1, %v874_v58 }
  0xb1   :  { %vm1128_vm13 = vcmp.ge.f32.partialorder %v1096_v7, 0.014222222  ;;  %v1019_v14 = vrot.slane %v1959_v38, 4  ;;  %v369_v8 = vmin.f32 %v272_v46, %v321_v63  ;;  %v177_v32 = vmin.f32 %v1848_v51, %v1872_v26 }
  0xb2   :  { %1287 = vst [vmem:[#allocation7 + $0xa0] sm:$0xff] %v1255_v15  ;;  %v1979_v62 = vsel %vm1128_vm13, 1.0, %v1504_v50  ;;  %v807_v4 = vmin.f32 %v662_v27, %v730_v39  ;;  %v273_v0 = vmin.f32 %v176_v54, %v1908_v57  ;;  %v178_v22 = vmin.f32 %v81_v12, %v130_v45 }
  0xb3   :  { %v1307_v6 = vadd.f32 %v1927_v44, %v1900_v16  ;;  %v1256_v61 = vmul.f32 %v1979_v62, %v1224_v9  ;;  %v1020_v13 = vsel %vm962_vm3, %v1018_v47, %v1019_v14  ;;  %v466_v43 = vmin.f32 %v369_v8, %v418_v21  ;;  %v1990_v16 = vld [vmem:[#allocation2 + $0x188] sm:$0xff] }
  0xb4   :  { %v952_v51 = vmin.f32 %v807_v4, %v875_v41  ;;  %v274_v40 = vmin.f32 %v177_v32, %v1919_v36  ;;  %v370_v11 = vmin.f32 %v273_v0, %v1948_v19  ;;  %v275_v29 = vmin.f32 %v178_v22, %v227_v60  ;;  %v1226_v4 = vld [vmem:[#allocation5 + $0xb8] sm:$0xff] }
  0xb5   :  { %1288 = vst [vmem:[#allocation7 + $0xa8] sm:$0xff] %v1256_v61  ;;  %v586_v24 = vrot.slane %v466_v43, 1  ;;  %v731_v28 = vrot.slane %v466_v43, 2  ;;  %v876_v42 = vrot.slane %v466_v43, 3  ;;  %v1021_v30 = vrot.slane %v466_v43, 4 }
  0xb6   :  { %v1322_v44 = vadd.f32 %v1384_v20, %v1916_v2  ;;  %v1097_v5 = vmin.f32 %v952_v51, %v1020_v13  ;;  %v371_v17 = vmin.f32 %v274_v40, %v1950_v52  ;;  %v467_v37 = vmin.f32 %v370_v11, %v1986_v18  ;;  %v421_v2 = vld [vmem:[#allocation2 + $0x190] sm:$0xf]  ;;  %v84_v61 = vld [vmem:[#allocation2 + $0x148] sm:$0xf]  ;;  %v133_v43 = vld [vmem:[#allocation2 + $0x160] sm:$0xf] }
  0xb7   :  { %v587_v34 = vsel %vm527_vm0, %v584_v10, %v586_v24  ;;  %v732_v46 = vsel %vm672_vm1, %v729_v53, %v731_v28  ;;  %v877_v25 = vsel %vm817_vm2, %v874_v58, %v876_v42  ;;  %v372_v48 = vmin.f32 %v275_v29, %v324_v23  ;;  %v2026_v23 = vld [vmem:[#allocation2 + $0x198] sm:$0xff]  ;;  %v2028_v24 = vld [vmem:[#allocation2 + $0x1a0] sm:$0xff] }
  0xb8   :  { %vm1129_vm14 = vcmp.ge.f32.partialorder %v1097_v5, 0.014222222  ;;  %v663_v35 = vmin.f32 %v1959_v38, %v587_v34  ;;  %v468_v54 = vmin.f32 %v371_v17, %v1990_v16  ;;  %v588_v55 = vrot.slane %v467_v37, 1  ;;  %v230_v17 = vld [vmem:[#allocation2 + $0x178] sm:$0xf] }
  0xb9   :  { %v2001_v20 = vsel %vm1129_vm14, 1.0, %v1504_v50  ;;  %v1022_v56 = vsel %vm962_vm3, %v1019_v14, %v1021_v30  ;;  %v733_v31 = vrot.slane %v467_v37, 2  ;;  %v878_v63 = vrot.slane %v467_v37, 3 }
  0xba   :  { %v1257_v10 = vmul.f32 %v2001_v20, %v1225_v33  ;;  %v808_v53 = vmin.f32 %v663_v35, %v732_v46  ;;  %v589_v1 = vrot.slane %v468_v54, 1  ;;  %v1023_v58 = vrot.slane %v467_v37, 4 }
  0xbb   :  { %v734_v47 = vrot.slane %v468_v54, 2  ;;  %v879_v7 = vrot.slane %v468_v54, 3  ;;  %v1024_v49 = vrot.slane %v468_v54, 4  ;;  %v469_v38 = vmin.f32 %v372_v48, %v421_v2 }
  0xbc   :  { %1289 = vst [vmem:[#allocation7 + $0xb0] sm:$0xff] %v1257_v10  ;;  %v953_v39 = vmin.f32 %v808_v53, %v877_v25  ;;  %v590_v12 = vsel %vm527_vm0, %v588_v55, %v589_v1  ;;  %v179_v45 = vmin.f32 %v1868_v3, %v1908_v57  ;;  %v180_v15 = vmin.f32 %v1872_v26, %v1919_v36  ;;  %v1227_v25 = vld [vmem:[#allocation5 + $0xc0] sm:$0xff] }
  0xbd   :  { %v2011_v9 = vadd.f32 %v1969_v59, %v1307_v6  ;;  %v664_v27 = vmin.f32 %v467_v37, %v590_v12  ;;  %v735_v41 = vsel %vm672_vm1, %v733_v31, %v734_v47  ;;  %v880_v21 = vsel %vm817_vm2, %v878_v63, %v879_v7 }
  0xbe   :  { %v1098_v14 = vmin.f32 %v953_v39, %v1022_v56  ;;  %v591_v8 = vrot.slane %v469_v38, 1  ;;  %v736_v32 = vrot.slane %v469_v38, 2  ;;  %v881_v60 = vrot.slane %v469_v38, 3 }
  0xbf   :  { %v809_v0 = vmin.f32 %v664_v27, %v735_v41  ;;  %v1025_v22 = vsel %vm962_vm3, %v1023_v58, %v1024_v49  ;;  %v276_v3 = vmin.f32 %v179_v45, %v1948_v19  ;;  %v277_v26 = vmin.f32 %v180_v15, %v1950_v52  ;;  %v424_v15 = vld [vmem:[#allocation2 + $0x1a8] sm:$0xf] }
  0xc0   :  { %vm1130_vm15 = vcmp.ge.f32.partialorder %v1098_v14, 0.014222222  ;;  %v592_v59 = vsel %vm527_vm0, %v589_v1, %v591_v8  ;;  %v737_v6 = vsel %vm672_vm1, %v734_v47, %v736_v32  ;;  %v1026_v13 = vrot.slane %v469_v38, 4  ;;  %v233_v14 = vld [vmem:[#allocation2 + $0x190] sm:$0xf] }
  0xc1   :  { %v2021_v51 = vadd.f32 %v1979_v62, %v1322_v44  ;;  %v2024_v40 = vsel %vm1130_vm15, 1.0, %v1504_v50  ;;  %v954_v11 = vmin.f32 %v809_v0, %v880_v21  ;;  %v665_v29 = vmin.f32 %v468_v54, %v592_v59  ;;  %v87_v62 = vld [vmem:[#allocation2 + $0x160] sm:$0xf]  ;;  %v136_v44 = vld [vmem:[#allocation2 + $0x178] sm:$0xf] }
  0xc2   :  { %v1258_v28 = vmul.f32 %v2024_v40, %v1226_v4  ;;  %v882_v42 = vsel %vm817_vm2, %v879_v7, %v881_v60  ;;  %v373_v30 = vmin.f32 %v276_v3, %v1986_v18  ;;  %v374_v5 = vmin.f32 %v277_v26, %v1990_v16  ;;  %v327_v7 = vld [vmem:[#allocation2 + $0x190] sm:$0xf] }
  0xc3   :  { %v1099_v37 = vmin.f32 %v954_v11, %v1025_v22  ;;  %v810_v33 = vmin.f32 %v665_v29, %v737_v6  ;;  %v181_v34 = vmin.f32 %v84_v61, %v133_v43  ;;  %v182_v46 = vmin.f32 %v1908_v57, %v1948_v19  ;;  %v90_v61 = vld [vmem:[#allocation2 + $0x178] sm:$0xf]  ;;  %v139_v59 = vld [vmem:[#allocation2 + $0x190] sm:$0xf] }
  0xc4   :  { %1290 = vst [vmem:[#allocation7 + $0xb8] sm:$0xff] %v1258_v28  ;;  %v1027_v48 = vsel %vm962_vm3, %v1024_v49, %v1026_v13  ;;  %v470_v35 = vmin.f32 %v373_v30, %v2026_v23  ;;  %v2039_v54 = vmin.f32 %v374_v5, %v2028_v24  ;;  %v183_v55 = vmin.f32 %v1919_v36, %v1950_v52  ;;  %v1228_v36 = vld [vmem:[#allocation5 + $0xc8] sm:$0xff]  ;;  %v2067_v11 = vld [vmem:[#allocation2 + $0x1b0] sm:$0xff]  ;;  %v2069_v29 = vld [vmem:[#allocation2 + $0x1b8] sm:$0xff] }
  0xc5   :  { %vm1131_vm4 = vcmp.ge.f32.partialorder %v1099_v37, 0.014222222  ;;  %v955_v2 = vmin.f32 %v810_v33, %v882_v42  ;;  %v278_v56 = vmin.f32 %v181_v34, %v230_v17  ;;  %v184_v31 = vmin.f32 %v87_v62, %v136_v44  ;;  %v330_v42 = vld [vmem:[#allocation2 + $0x1a8] sm:$0xf] }
  0xc6   :  { %v2044_v63 = vsel %vm1131_vm4, 1.0, %v1504_v50  ;;  %v593_v57 = vrot.slane %v470_v35, 1  ;;  %v594_v10 = vrot.slane %v2039_v54, 1  ;;  %v738_v53 = vrot.slane %v470_v35, 2 }
  0xc7   :  { %v1259_v1 = vmul.f32 %v2044_v63, %v1227_v25  ;;  %v1100_v58 = vmin.f32 %v955_v2, %v1027_v48  ;;  %v739_v47 = vrot.slane %v2039_v54, 2  ;;  %v279_v49 = vmin.f32 %v182_v46, %v1986_v18 }
  0xc8   :  { %v595_v38 = vsel %vm527_vm0, %v593_v57, %v594_v10  ;;  %v883_v39 = vrot.slane %v470_v35, 3  ;;  %v884_v12 = vrot.slane %v2039_v54, 3  ;;  %v1028_v45 = vrot.slane %v470_v35, 4  ;;  %v427_v57 = vld [vmem:[#allocation2 + $0x1c0] sm:$0xf] }
  0xc9   :  { %1291 = vst [vmem:[#allocation7 + $0xc0] sm:$0xff] %v1259_v1  ;;  %vm1132_vm5 = vcmp.ge.f32.partialorder %v1100_v58, 0.014222222  ;;  %v666_v27 = vmin.f32 %v470_v35, %v595_v38  ;;  %v740_v41 = vsel %vm672_vm1, %v738_v53, %v739_v47  ;;  %v1029_v21 = vrot.slane %v2039_v54, 4 }
  0xca   :  { %v2055_v8 = vsel %vm1132_vm5, 1.0, %v1504_v50  ;;  %v885_v32 = vsel %vm817_vm2, %v883_v39, %v884_v12  ;;  %v375_v60 = vmin.f32 %v278_v56, %v327_v7  ;;  %v280_v4 = vmin.f32 %v183_v55, %v1990_v16 }
  0xcb   :  { %v2061_v0 = vadd.f32 %v2001_v20, %v2011_v9  ;;  %v1260_v22 = vmul.f32 %v2055_v8, %v1228_v36  ;;  %v811_v3 = vmin.f32 %v666_v27, %v740_v41  ;;  %v1030_v26 = vsel %vm962_vm3, %v1028_v45, %v1029_v21 }
  0xcc   :  { %v472_v6 = vmin.f32 %v375_v60, %v424_v15  ;;  %v376_v13 = vmin.f32 %v279_v49, %v2026_v23  ;;  %v377_v43 = vmin.f32 %v280_v4, %v2028_v24  ;;  %v281_v28 = vmin.f32 %v184_v31, %v233_v14 }
  0xcd   :  { %v2073_v20 = vadd.f32 %v2024_v40, %v2021_v51  ;;  %1292 = vst [vmem:[#allocation7 + $0xc8] sm:$0xff] %v1260_v22  ;;  %v956_v9 = vmin.f32 %v811_v3, %v885_v32  ;;  %v185_v30 = vmin.f32 %v1948_v19, %v1986_v18  ;;  %v186_v5 = vmin.f32 %v1950_v52, %v1990_v16  ;;  %v1229_v40 = vld [vmem:[#allocation5 + $0xd0] sm:$0xff]  ;;  %v1230_v22 = vld [vmem:[#allocation5 + $0xd8] sm:$0xff] }
  0xce   :  { %v596_v17 = vrot.slane %v472_v6, 1  ;;  %v741_v62 = vrot.slane %v472_v6, 2  ;;  %v886_v44 = vrot.slane %v472_v6, 3  ;;  %v187_v37 = vmin.f32 %v90_v61, %v139_v59 }
  0xcf   :  { %v1101_v33 = vmin.f32 %v956_v9, %v1030_v26  ;;  %v1031_v34 = vrot.slane %v472_v6, 4  ;;  %v473_v46 = vmin.f32 %v376_v13, %v2067_v11  ;;  %v474_v51 = vmin.f32 %v377_v43, %v2069_v29  ;;  %v428_v6 = vld [vmem:[#allocation2 + $0x1c8] sm:$0xff]  ;;  %v429_v43 = vld [vmem:[#allocation2 + $0x1d0] sm:$0xff] }
  0xd0   :  { %v597_v25 = vsel %vm527_vm0, %v594_v10, %v596_v17  ;;  %v742_v48 = vsel %vm672_vm1, %v739_v47, %v741_v62  ;;  %v887_v19 = vsel %vm817_vm2, %v884_v12, %v886_v44  ;;  %v378_v18 = vmin.f32 %v281_v28, %v330_v42  ;;  %v236_v47 = vld [vmem:[#allocation2 + $0x1a8] sm:$0xf]  ;;  %v333_v28 = vld [vmem:[#allocation2 + $0x1c0] sm:$0xf] }
  0xd1   :  { %vm1133_vm6 = vcmp.ge.f32.partialorder %v1101_v33, 0.014222222  ;;  %v667_v52 = vmin.f32 %v2039_v54, %v597_v25  ;;  %v598_v16 = vrot.slane %v473_v46, 1  ;;  %v599_v35 = vrot.slane %v474_v51, 1  ;;  %v1231_v62 = vld [vmem:[#allocation5 + $0xe0] sm:$0xff] }
  0xd2   :  { %v2086_v55 = vsel %vm1133_vm6, 1.0, %v1504_v50  ;;  %v743_v2 = vrot.slane %v473_v46, 2  ;;  %v744_v56 = vrot.slane %v474_v51, 2  ;;  %v888_v31 = vrot.slane %v473_v46, 3 }
  0xd3   :  { %v1261_v53 = vmul.f32 %v2086_v55, %v1229_v40  ;;  %v812_v10 = vmin.f32 %v667_v52, %v742_v48  ;;  %v1032_v1 = vsel %vm962_vm3, %v1029_v21, %v1031_v34  ;;  %v600_v58 = vsel %vm527_vm0, %v598_v16, %v599_v35 }
  0xd4   :  { %v668_v7 = vmin.f32 %v473_v46, %v600_v58  ;;  %v745_v54 = vsel %vm672_vm1, %v743_v2, %v744_v56  ;;  %v889_v49 = vrot.slane %v474_v51, 3  ;;  %v1033_v36 = vrot.slane %v473_v46, 4  ;;  %v430_v46 = vld [vmem:[#allocation2 + $0x1d8] sm:$0xf] }
  0xd5   :  { %1293 = vst [vmem:[#allocation7 + $0xd0] sm:$0xff] %v1261_v53  ;;  %v957_v38 = vmin.f32 %v812_v10, %v887_v19  ;;  %v1034_v39 = vrot.slane %v474_v51, 4  ;;  %v475_v12 = vmin.f32 %v378_v18, %v427_v57  ;;  %v282_v45 = vmin.f32 %v185_v30, %v2026_v23 }
  0xd6   :  { %v813_v15 = vmin.f32 %v668_v7, %v745_v54  ;;  %v890_v27 = vsel %vm817_vm2, %v888_v31, %v889_v49  ;;  %v283_v41 = vmin.f32 %v186_v5, %v2028_v24  ;;  %v284_v21 = vmin.f32 %v187_v37, %v236_v47 }
  0xd7   :  { %v1102_v14 = vmin.f32 %v957_v38, %v1032_v1  ;;  %v1035_v32 = vsel %vm962_vm3, %v1033_v36, %v1034_v39  ;;  %v601_v60 = vrot.slane %v475_v12, 1  ;;  %v746_v4 = vrot.slane %v475_v12, 2  ;;  %v1232_v1 = vld [vmem:[#allocation5 + $0xe8] sm:$0xff] }
  0xd8   :  { %v958_v3 = vmin.f32 %v813_v15, %v890_v27  ;;  %v891_v26 = vrot.slane %v475_v12, 3  ;;  %v1036_v61 = vrot.slane %v475_v12, 4  ;;  %v379_v59 = vmin.f32 %v282_v45, %v2067_v11 }
  0xd9   :  { %vm1134_vm7 = vcmp.ge.f32.partialorder %v1102_v14, 0.014222222  ;;  %v602_v23 = vsel %vm527_vm0, %v599_v35, %v601_v60  ;;  %v747_v13 = vsel %vm672_vm1, %v744_v56, %v746_v4  ;;  %v380_v24 = vmin.f32 %v283_v41, %v2069_v29  ;;  %v1233_v4 = vld [vmem:[#allocation5 + $0xf0] sm:$0xff] }
  0xda   :  { %v1310_v9 = vadd.f32 %v2044_v63, %v2061_v0  ;;  %v1392_v42 = vsel %vm1134_vm7, 1.0, %v1504_v50  ;;  %v1103_v30 = vmin.f32 %v958_v3, %v1035_v32  ;;  %v669_v5 = vmin.f32 %v474_v51, %v602_v23 }
  0xdb   :  { %v1262_v17 = vmul.f32 %v1392_v42, %v1230_v22  ;;  %v892_v11 = vsel %vm817_vm2, %v889_v49, %v891_v26  ;;  %v1037_v44 = vsel %vm962_vm3, %v1034_v39, %v1036_v61  ;;  %v476_v37 = vmin.f32 %v379_v59, %v428_v6  ;;  %v1234_v6 = vld [vmem:[#allocation5 + $0xf8] sm:$0xff] }
  0xdc   :  { %vm1135_vm8 = vcmp.ge.f32.partialorder %v1103_v30, 0.014222222  ;;  %v814_v33 = vmin.f32 %v669_v5, %v747_v13  ;;  %v477_v34 = vmin.f32 %v380_v24, %v429_v43  ;;  %v381_v29 = vmin.f32 %v284_v21, %v333_v28 }
  0xdd   :  { %1294 = vst [vmem:[#allocation7 + $0xd8] sm:$0xff] %v1262_v17  ;;  %v1393_v40 = vsel %vm1135_vm8, 1.0, %v1504_v50  ;;  %v603_v63 = vrot.slane %v476_v37, 1  ;;  %v748_v0 = vrot.slane %v476_v37, 2  ;;  %v893_v25 = vrot.slane %v476_v37, 3 }
  0xde   :  { %v1263_v48 = vmul.f32 %v1393_v40, %v1231_v62  ;;  %v959_v51 = vmin.f32 %v814_v33, %v892_v11  ;;  %v604_v19 = vrot.slane %v477_v34, 1  ;;  %v749_v18 = vrot.slane %v477_v34, 2 }
  0xdf   :  { %v894_v52 = vrot.slane %v477_v34, 3  ;;  %v1038_v16 = vrot.slane %v476_v37, 4  ;;  %v478_v35 = vmin.f32 %v381_v29, %v430_v46  ;;  %v1039_v57 = vrot.slane %v477_v34, 4 }
  0xe0   :  { %1295 = vst [vmem:[#allocation7 + $0xe0] sm:$0xff] %v1263_v48  ;;  %v1104_v2 = vmin.f32 %v959_v51, %v1037_v44  ;;  %v605_v56 = vsel %vm527_vm0, %v603_v63, %v604_v19  ;;  %v750_v31 = vsel %vm672_vm1, %v748_v0, %v749_v18  ;;  %v1325_v53 = vadd.f32 %v2055_v8, %v2073_v20 }
  0xe1   :  { %v1311_v10 = vadd.f32 %v2086_v55, %v1310_v9  ;;  %v670_v58 = vmin.f32 %v476_v37, %v605_v56  ;;  %v606_v47 = vrot.slane %v478_v35, 1  ;;  %v895_v7 = vsel %vm817_vm2, %v893_v25, %v894_v52 }
  0xe2   :  { %vm1136_vm9 = vcmp.ge.f32.partialorder %v1104_v2, 0.014222222  ;;  %v751_v54 = vrot.slane %v478_v35, 2  ;;  %v896_v49 = vrot.slane %v478_v35, 3  ;;  %v1041_v12 = vrot.slane %v478_v35, 4 }
  0xe3   :  { %v1394_v36 = vsel %vm1136_vm9, 1.0, %v1504_v50  ;;  %v815_v38 = vmin.f32 %v670_v58, %v750_v31  ;;  %v607_v39 = vsel %vm527_vm0, %v604_v19, %v606_v47  ;;  %v1040_v15 = vsel %vm962_vm3, %v1038_v16, %v1039_v57 }
  0xe4   :  { %v1264_v45 = vmul.f32 %v1394_v36, %v1232_v1  ;;  %v671_v8 = vmin.f32 %v477_v34, %v607_v39  ;;  %v752_v20 = vsel %vm672_vm1, %v749_v18, %v751_v54  ;;  %v897_v27 = vsel %vm817_vm2, %v894_v52, %v896_v49 }
  0xe5   :  { %v960_v55 = vmin.f32 %v815_v38, %v895_v7  ;;  %v1326_v41 = vadd.f32 %v1392_v42, %v1325_v53  ;;  %v1042_v32 = vsel %vm962_vm3, %v1039_v57, %v1041_v12  ;;  %v1312_v60 = vadd.f32 %v1393_v40, %v1311_v10 }
  0xe6   :  { %1296 = vst [vmem:[#allocation7 + $0xe8] sm:$0xff] %v1264_v45  ;;  %v816_v21 = vmin.f32 %v671_v8, %v752_v20 }
  0xe7   :  { %v1105_v14 = vmin.f32 %v960_v55, %v1040_v15  ;;  %v1327_v61 = vadd.f32 %v1394_v36, %v1326_v41 }
  0xe8   :  { %v961_v22 = vmin.f32 %v816_v21, %v897_v27 }
  0xe9   :  { %vm1137_vm0 = vcmp.ge.f32.partialorder %v1105_v14, 0.014222222 }
  0xea   :  { %v1395_v3 = vsel %vm1137_vm0, 1.0, %v1504_v50  ;;  %v1106_v26 = vmin.f32 %v961_v22, %v1042_v32 }
  0xeb   :  { %v1265_v59 = vmul.f32 %v1395_v3, %v1233_v4  ;;  %v1313_v23 = vadd.f32 %v1395_v3, %v1312_v60 }
  0xec   :  { %vm1138_vm1 = vcmp.ge.f32.partialorder %v1106_v26, 0.014222222 }
  0xed   :  { %1297 = vst [vmem:[#allocation7 + $0xf0] sm:$0xff] %v1265_v59  ;;  %v1396_v13 = vsel %vm1138_vm1, 1.0, %v1504_v50  ;;  %1329 = vst [vmem:[#allocation8] sm:$0xff] %v1313_v23 }
  0xee   :  { %v1266_v24 = vmul.f32 %v1396_v13, %v1234_v6  ;;  %v1328_v43 = vadd.f32 %v1396_v13, %v1327_v61 }
  0xf0   :  { %1298 = vst [vmem:[#allocation7 + $0xf8] sm:$0xff] %v1266_v24  ;;  %1330 = vst [vmem:[#allocation8 + $0x8] sm:$0xff] %v1328_v43 }
  0xf1   :  { %1459 = shalt.err (!%p1456_p6)
}
  0xf2   :  { %s1460_s16 = scalar_lea.hbm %s2159_s2, 4096 }
  0xf3   :  { %p1461_p7 = scmp.ne.s32.totalorder %s2159_s2, %s1460_s16  ;;  %p1464_p8 = scmp.lt.u32.totalorder %s1460_s16, %s2159_s2 }
  0xf5   :  { %p1466_p9 = pnand %p1464_p8, %p1461_p7 }
  0xf7   :  { %1469 = shalt.err (!%p1466_p9)
}
  0xf8   :  { %1342 = dma.vmem_to_hbm [thread:$0]  %s1337_s10, 4096, %s2159_s2, [#allocation4], %s1501_s22, %s1501_s22, %s1502_s23  }
  0xf9   :  { %s1470_s25 = scalar_lea.vmem %s2120_s12, 256  ;;  %p1475_p11 = scmp.lt.s32.totalorder %s2120_s12, %s2120_s12 }
  0xfa   :  { %p1471_p10 = scmp.ne.s32.totalorder %s2120_s12, %s1470_s25  ;;  %p1476_p12 = scmp.lt.s32.totalorder %s1470_s25, %s1470_s25 }
  0xfc   :  { %p1477_p13 = por %p1476_p12, %p1475_p11 }
  0xfe   :  { %p1478_p0 = pnand %p1477_p13, %p1471_p10 }
 0x100   :  { %1481 = shalt.err (!%p1478_p0)
}
 0x101   :  { %s1482_s28 = scalar_lea.hbm %s2160_s3, 256 }
 0x102   :  { %p1483_p1 = scmp.ne.s32.totalorder %s2160_s3, %s1482_s28  ;;  %p1486_p2 = scmp.lt.u32.totalorder %s1482_s28, %s2160_s3 }
 0x104   :  { %p1488_p3 = pnand %p1486_p2, %p1483_p1 }
 0x106   :  { %1491 = shalt.err (!%p1488_p3)
}
 0x107   :  { %1354 = dma.vmem_to_hbm [thread:$0]  %s2120_s12, 256, %s2160_s3, [#allocation9], %s1501_s22, %s1501_s22, %s1502_s23  }
 0x108   :  { %1496 = dma.done.wait [#allocation4], 4096  }
 0x109   :  { %1497 = vsyncadd [#allocation4], 4294963200 }
 0x10a   :  { %1498 = dma.done.wait [#allocation9], 256  }
 0x10b   :  { %1499 = vsyncadd [#allocation9], 4294967040 }
 0x10c   :  { %1361 = vsyncpa [#allocation3], 1 }
 0x10d   :  { %1362 = vsyncpa [#allocation6], 1 }
 0x10e   :  { %1363 = vsyncpa [#allocation4], 1 }
 0x10f   :  { %1364 = vsyncpa [#allocation9], 1 }

</bundles_post_ra>
